<compile_context>
chip_gen: v7x
topology: tpu7x:2x2x1
jax: 0.10.0
libtpu: 0.0.40
codegen_flags: <defaults>
</compile_context>

<pallas_src>
import functools
import math

import jax
import jax.numpy as jnp
from jax.experimental import pallas as pl
from jax.experimental.pallas import tpu as pltpu

_BN_EPS = 1e-5


# ----------------------------------------------------------------------------
# Small helpers
# ----------------------------------------------------------------------------
@functools.lru_cache(maxsize=None)
def _vmem_limit_bytes():
    """Scoped-VMEM limit: ~3/4 of physical VMEM, capped at 96 MiB (the 16/32
    MiB defaults were the binding constraint, not the hardware)."""
    try:
        phys = int(pltpu.get_tpu_info().vmem_capacity_bytes)
    except Exception:
        phys = 128 << 20
    return int(min(96 << 20, max(32 << 20, (phys * 3) // 4)))


def _largest_divisor(n, cap):
    for d in range(min(n, cap), 0, -1):
        if n % d == 0:
            return d
    return 1


def _pick_rows(H, W, cin_total, tcj, pool, max_rows=None):
    """Row-block height for conv3x3: largest divisor of H (even when pooling
    is fused) whose per-block activation footprint stays within a few MiB, so
    VMEM use is bounded independently of image size (v7x has only 64 MiB)."""
    budget = 4 << 20
    cap = H if max_rows is None else max(1, min(H, max_rows))
    divisors = [r for r in range(H, 0, -1) if H % r == 0]
    valid = [r for r in divisors if (not pool) or (r % 2 == 0)] or divisors
    for r in valid:
        if r > cap:
            continue
        per_block = (r + 4) * W * cin_total * 2 * 5 + r * W * tcj * 8
        if per_block <= budget:
            return r
    return valid[-1]


# ----------------------------------------------------------------------------
# Pallas kernels
# ----------------------------------------------------------------------------
def _conv3x3_kernel(*refs, n_in, R, W, act, pool):
    """Fused 3x3 'same' conv + folded-BN bias + activation (+ optional fused
    2x2 max-pool) for one (row-block, Cout-tile) grid step.

    refs (inputs then outputs):
      for i in range(n_in):
        refs[2i]   : x_i  ((R+4)*W, Cin_i)  bf16, H padded by 2 rows each side,
                                            rows flattened row-major over (h,w)
        refs[2i+1] : w_i  (3, 3*Cin_i, TCj) bf16, [kh][kw-major, Cin][Cout]
      refs[2*n_in]     : bias (1, TCj) f32
      refs[2*n_in + 1] : out  (R*W, TCj) bf16
      refs[2*n_in + 2] : pooled out ((R/2)*(W/2), TCj) bf16   (only if pool)
    """
    b_ref = refs[2 * n_in]
    o_ref = refs[2 * n_in + 1]
    pool_ref = refs[2 * n_in + 2] if pool else None
    RW = R * W
    SW = (R + 2) * W
    tcj = o_ref.shape[-1]

    # Edge masks for the horizontally shifted taps, hoisted out of all loops.
    if W > 1:
        col = jax.lax.broadcasted_iota(jnp.int32, (SW, 1), 0) % W
        not_first = col != 0
        not_last = col != (W - 1)

    # Single f32 accumulator; output stored exactly once (no scratch RMW).
    acc = jnp.zeros((RW, tcj), jnp.float32)
    for i in range(n_in):
        x_ref = refs[2 * i]
        w_ref = refs[2 * i + 1]
        # Three horizontally shifted streams, loaded once per block (not per
        # tap) and folded into K (K = 3*Cin) -> 3 matmuls per input.
        # TODO(synk): the two shifted streams could be derived from x_c with a
        # single pltpu.roll(+-1) on the sublane axis (XLU) instead of two extra
        # sublane-misaligned VMEM reads.
        x_c = x_ref[pl.ds(W, SW), :]
        if W > 1:
            x_w = jnp.where(not_first, x_ref[pl.ds(W - 1, SW), :], 0.0)
            x_e = jnp.where(not_last, x_ref[pl.ds(W + 1, SW), :], 0.0)
        else:
            x_w = jnp.zeros_like(x_c)   # W == 1: no horizontal neighbours
            x_e = jnp.zeros_like(x_c)
        xh = jnp.concatenate([x_w, x_c, x_e], axis=-1)          # (SW, 3*Cin_i)
        for kh in range(3):                                     # vertical taps
            acc += jnp.dot(xh[kh * W:kh * W + RW], w_ref[kh],
                           preferred_element_type=jnp.float32)

    y = acc + b_ref[...]
    if act == "relu":
        y = jnp.maximum(y, 0.0)
    o_ref[...] = y.astype(o_ref.dtype)

    if pool:
        # Fused MaxPool2d(2): saves a separate kernel launch and an extra HBM
        # read of the skip tensor per encoder stage.
        y2 = y.reshape(R // 2, 2 * W, tcj)
        a = jnp.maximum(y2[:, :W, :], y2[:, W:, :])             # row pairs
        a = a.reshape((R // 2) * (W // 2), 2, tcj)
        yp = jnp.maximum(a[:, 0, :], a[:, 1, :])                # column pairs
        pool_ref[...] = yp.astype(pool_ref.dtype)


def _deconv2x2_kernel(x_ref, w_ref, b_ref, o_ref):
    """ConvTranspose2d(k=2, s=2) as a per-pixel matmul; the 2x2 sub-pixel
    interleave is written directly by the kernel (no XLA pass afterwards).

    x_ref : (TM, W, Cin) bf16
    w_ref : (Cin, 4*Cout) bf16, columns ordered (kh, kw, c)
    b_ref : (1, 4*Cout) f32
    o_ref : (TM, 2, W, 2*Cout) bf16  -- row-major == (N, 2H, 2W, Cout)
    """
    TM, W, Cin = x_ref.shape
    C2 = w_ref.shape[-1] // 2
    x = x_ref[...].reshape(TM * W, Cin)
    y = jnp.dot(x, w_ref[...], preferred_element_type=jnp.float32) + b_ref[...]
    o_ref[:, 0, :, :] = y[:, :C2].reshape(TM, W, C2).astype(o_ref.dtype)
    o_ref[:, 1, :, :] = y[:, C2:].reshape(TM, W, C2).astype(o_ref.dtype)


def _head_kernel(x_ref, w_ref, b_ref, o_ref):
    """OutTransition: 1x1 conv (Cout padded to 128 lanes) + sigmoid."""
    y = jnp.dot(x_ref[...], w_ref[...], preferred_element_type=jnp.float32)
    y = y + b_ref[...]
    o_ref[...] = pl.reciprocal(1.0 + jnp.exp(-y), approx=True).astype(o_ref.dtype)


# ----------------------------------------------------------------------------
# Kernel wrappers (NHWC, bf16 activations)
# ----------------------------------------------------------------------------
def conv3x3(xs, p, act="relu", pool=False, max_rows=None):
    """3x3 same-padding conv over the channel-concatenation of `xs` (the concat
    itself never materializes), with folded BN, activation and optionally a
    fused 2x2 max-pool.  xs: list of (N, H, W, C_i) arrays (same N, H, W)."""
    slabs, bias = p["w"], p["b"]
    N, H, W, _ = xs[0].shape
    Cout = slabs[0].shape[-1]
    cins = [s.shape[1] // 3 for s in slabs]
    if pool:
        assert H % 2 == 0 and W % 2 == 0, (H, W)

    # TODO(synk): prefer 128-wide Cout tiles on v5e (4x128^2 MXUs).
    TCj = Cout if Cout <= 256 else 256
    J = Cout // TCj
    R = _pick_rows(H, W, sum(cins), TCj, pool, max_rows)
    B = H // R
    Rp = R + 4
    NB = N * B
    RW = R * W

    # Build per-input H-halo row blocks (one light XLA pass per input; replaces
    # the old pad pass).  Block b of image n covers padded rows [bR, bR+R+4).
    xbs = []
    for x, c in zip(xs, cins):
        x = x.astype(jnp.bfloat16)
        if x.shape[-1] < c:                       # stem: pad channels to 8
            x = jnp.pad(x, ((0, 0), (0, 0), (0, 0), (0, c - x.shape[-1])))
        xp = jnp.pad(x, ((0, 0), (2, 2), (0, 0), (0, 0)))
        if B == 1:
            xb = xp.reshape(N, Rp * W, c)
        else:
            parts = [jax.lax.slice_in_dim(xp, b * R, b * R + Rp, axis=1)
                     for b in range(B)]
            xb = jnp.stack(parts, axis=1).reshape(NB, Rp * W, c)
        xbs.append(xb)

    # Grid ordering: keep whichever operand is more expensive to re-stream
    # resident across the other axis (Pallas skips the DMA when the block index
    # is unchanged between consecutive steps).
    w_bytes = sum(int(s.size) for s in slabs) * 2
    x_bytes = sum(int(b.size) for b in xbs) * 2
    if w_bytes * (NB - 1) > x_bytes * (J - 1):
        grid = (J, NB)
        xmap = lambda j, m: (m, 0, 0)
        wmap = lambda j, m: (0, 0, j)
        bmap = lambda j, m: (0, j)
        omap = lambda j, m: (m, 0, j)
    else:
        grid = (NB, J)
        xmap = lambda m, j: (m, 0, 0)
        wmap = lambda m, j: (0, 0, j)
        bmap = lambda m, j: (0, j)
        omap = lambda m, j: (m, 0, j)

    in_specs, operands = [], []
    for xb, slab, c in zip(xbs, slabs, cins):
        in_specs.append(pl.BlockSpec((None, Rp * W, c), xmap))
        in_specs.append(pl.BlockSpec((3, 3 * c, TCj), wmap))
        operands += [xb, slab]
    in_specs.append(pl.BlockSpec((1, TCj), bmap))
    operands.append(bias)

    out_shapes = [jax.ShapeDtypeStruct((NB, RW, Cout), jnp.bfloat16)]
    out_specs = [pl.BlockSpec((None, RW, TCj), omap)]
    if pool:
        out_shapes.append(jax.ShapeDtypeStruct((NB, (R // 2) * (W // 2), Cout),
                                               jnp.bfloat16))
        out_specs.append(pl.BlockSpec((None, (R // 2) * (W // 2), TCj), omap))

    kernel = functools.partial(_conv3x3_kernel, n_in=len(xs), R=R, W=W,
                               act=act, pool=pool)
    res = pl.pallas_call(
        kernel,
        out_shape=tuple(out_shapes) if pool else out_shapes[0],
        grid_spec=pltpu.PrefetchScalarGridSpec(
            num_scalar_prefetch=0,
            grid=grid,
            in_specs=in_specs,
            out_specs=tuple(out_specs) if pool else out_specs[0]),
        compiler_params=pltpu.CompilerParams(
            dimension_semantics=("parallel", "parallel"),
            vmem_limit_bytes=_vmem_limit_bytes()),
    )(*operands)

    if pool:
        y, yp = res
        return (y.reshape(N, H, W, Cout),
                yp.reshape(N, H // 2, W // 2, Cout))
    return res.reshape(N, H, W, Cout)


def conv_transpose2x2(x, p):
    """ConvTranspose2d(k=2, s=2).  The sub-pixel layout (N, 2H, 2W, Cout) is
    produced directly by the kernel's output block; the wrapper reshape is free."""
    N, H, W, Cin = x.shape
    w, b4 = p["w"], p["b4"]                    # (Cin, 4*Cout) bf16, (1, 4*Cout) f32
    C4 = w.shape[1]
    C2 = C4 // 2
    NH = N * H
    x3 = x.astype(jnp.bfloat16).reshape(NH, W, Cin)

    row_cap = max(1, 4096 // max(W, 1))
    split_cap = max(1, NH // 2) if NH >= 2 else 1
    TM = _largest_divisor(NH, max(1, min(row_cap, split_cap)))

    out = pl.pallas_call(
        _deconv2x2_kernel,
        out_shape=jax.ShapeDtypeStruct((NH, 2, W, C2), jnp.bfloat16),
        grid_spec=pltpu.PrefetchScalarGridSpec(
            num_scalar_prefetch=0,
            grid=(NH // TM,),
            in_specs=[pl.BlockSpec((TM, W, Cin), lambda m: (m, 0, 0)),
                      pl.BlockSpec((Cin, C4), lambda m: (0, 0)),
                      pl.BlockSpec((1, C4), lambda m: (0, 0))],
            out_specs=pl.BlockSpec((TM, 2, W, C2), lambda m: (m, 0, 0, 0))),
        compiler_params=pltpu.CompilerParams(
            dimension_semantics=("parallel",),
            vmem_limit_bytes=_vmem_limit_bytes()),
    )(x3, w, b4)
    return out.reshape(N, 2 * H, 2 * W, C2 // 2)


def out_transition(x, p, out_classes):
    """1x1 conv + sigmoid; the channel dim is padded to 128 lanes in-kernel and
    sliced back here (out_classes is tiny)."""
    N, H, W, C = x.shape
    M = N * H * W
    X = x.astype(jnp.bfloat16).reshape(M, C)
    w, b = p["w"], p["b"]                       # (C, 128) bf16, (1, 128) f32
    OCp = w.shape[1]
    cap = max(1, min(M // 2, 4096)) if M >= 16 else M
    TM = _largest_divisor(M, cap)

    out = pl.pallas_call(
        _head_kernel,
        out_shape=jax.ShapeDtypeStruct((M, OCp), jnp.float32),
        grid_spec=pltpu.PrefetchScalarGridSpec(
            num_scalar_prefetch=0,
            grid=(M // TM,),
            in_specs=[pl.BlockSpec((TM, C), lambda m: (m, 0)),
                      pl.BlockSpec((C, OCp), lambda m: (0, 0)),
                      pl.BlockSpec((1, OCp), lambda m: (0, 0))],
            out_specs=pl.BlockSpec((TM, OCp), lambda m: (m, 0))),
        compiler_params=pltpu.CompilerParams(
            dimension_semantics=("parallel",)),
    )(X, w, b)
    return out[:, :out_classes].reshape(N, H, W, out_classes)


# ----------------------------------------------------------------------------
# UNet building blocks (NHWC, bf16)
# ----------------------------------------------------------------------------
def double_conv(xs, p, act="relu", pool_last=False):
    h = conv3x3(xs, p["c1"], act=act)
    return conv3x3([h], p["c2"], act=act, pool=pool_last)


def down_transition(x, p):
    skip, pooled = double_conv([x], p, pool_last=True)   # pool fused in conv c2
    return pooled, skip                                   # dropout=0 -> identity


def up_transition(x, skip, p):
    up = conv_transpose2x2(x, p["up"])
    # torch.cat([up, skip], 1) never materializes: the next conv reads both
    # operands and sums their K contributions in-kernel.
    return double_conv([up, skip], p["dc"])


def unet_forward(x_nchw, params, out_classes):
    x = jnp.transpose(x_nchw, (0, 2, 3, 1)).astype(jnp.bfloat16)   # NCHW -> NHWC
    d64, s64 = down_transition(x, params["down64"])
    d128, s128 = down_transition(d64, params["down128"])
    d256, s256 = down_transition(d128, params["down256"])
    d512, s512 = down_transition(d256, params["down512"])
    d1024 = double_conv([d512], params["down1024"])                # no pool
    u512 = up_transition(d1024, s512, params["up512"])
    u256 = up_transition(u512, s256, params["up256"])
    u128 = up_transition(u256, s128, params["up128"])
    u64 = up_transition(u128, s64, params["up64"])
    out = out_transition(u64, params["out"], out_classes)
    return [jnp.transpose(out, (0, 3, 1, 2))]                      # NHWC -> NCHW


# ----------------------------------------------------------------------------
# Deterministic synthetic parameters.  Weights are pre-laid-out / pre-cast and
# BatchNorm (eval mode) is folded, so the forward pass does no weight prep.
# ----------------------------------------------------------------------------
def _conv_params(key, cins, cout):
    """3x3 conv over the concatenation of input groups `cins`.
    Each group's slab has layout (3, 3*Cg, Cout): a PyTorch weight
    (Cout, Cin, 3, 3) maps via permute(2, 3, 1, 0) -> (3, 3, Cin, Cout),
    split along Cin into groups, then reshape(3, 3*Cg, Cout)."""
    cin_total = sum(cins)
    fan_in = 9.0 * cin_total
    bn_scale = 1.0 / math.sqrt(1.0 + _BN_EPS)     # gamma=1, beta=0, mean=0, var=1
    keys = jax.random.split(key, len(cins) + 1)
    slabs = []
    for i, c in enumerate(cins):
        cp = max(c, 8)                             # keep tiny stems sublane-friendly
        w = jax.random.normal(keys[i], (3, 3, cp, cout), jnp.float32)
        w = w / math.sqrt(fan_in)
        if cp != c:                                # padded channels contribute 0
            mask = (jnp.arange(cp) < c).astype(jnp.float32)[None, None, :, None]
            w = w * mask
        slabs.append((w * bn_scale).reshape(3, 3 * cp, cout).astype(jnp.bfloat16))
    b = jax.random.normal(keys[-1], (cout,), jnp.float32) * 0.01
    b = (b * bn_scale).reshape(1, cout)
    return {"w": slabs, "b": b}


def _double_conv_params(key, cins, cout):
    k1, k2 = jax.random.split(key)
    return {"c1": _conv_params(k1, cins, cout),
            "c2": _conv_params(k2, [cout], cout)}


def _up_params(key, cin, cout):
    """ConvTranspose2d(k=2, s=2) weight laid out as (Cin, 4*Cout) with columns
    ordered (kh, kw, c): a PyTorch weight (Cin, Cout, 2, 2) maps via
    permute(0, 2, 3, 1).reshape(Cin, 4*Cout)."""
    k1, k2, k3 = jax.random.split(key, 3)
    w = jax.random.normal(k1, (cin, 4 * cout), jnp.float32) / math.sqrt(cin * 4.0)
    b = jax.random.normal(k2, (cout,), jnp.float32) * 0.01
    b4 = jnp.tile(b, 4).reshape(1, 4 * cout)
    return {"up": {"w": w.astype(jnp.bfloat16), "b4": b4},
            "dc": _double_conv_params(k3, [cout, cout], cout)}   # [up, skip]


def init_unet_params(key, in_channels, out_classes):
    ch = [64, 128, 256, 512, 1024]
    keys = jax.random.split(key, 10)
    ko_w, ko_b = jax.random.split(keys[9])
    oc_pad = 128                                   # lane-dense head output
    w_out = jax.random.normal(ko_w, (ch[0], out_classes), jnp.float32)
    w_out = w_out / math.sqrt(float(ch[0]))
    w_out = jnp.pad(w_out, ((0, 0), (0, oc_pad - out_classes)))
    b_out = jax.random.normal(ko_b, (out_classes,), jnp.float32) * 0.01
    b_out = jnp.pad(b_out, (0, oc_pad - out_classes)).reshape(1, oc_pad)
    return {
        "down64": _double_conv_params(keys[0], [in_channels], ch[0]),
        "down128": _double_conv_params(keys[1], [ch[0]], ch[1]),
        "down256": _double_conv_params(keys[2], [ch[1]], ch[2]),
        "down512": _double_conv_params(keys[3], [ch[2]], ch[3]),
        "down1024": _double_conv_params(keys[4], [ch[3]], ch[4]),
        "up512": _up_params(keys[5], ch[4], ch[3]),
        "up256": _up_params(keys[6], ch[3], ch[2]),
        "up128": _up_params(keys[7], ch[2], ch[1]),
        "up64": _up_params(keys[8], ch[1], ch[0]),
        "out": {"w": w_out.astype(jnp.bfloat16), "b": b_out},
    }


# TODO(synk): train-mode BatchNorm (batch statistics) and dropout_chance > 0
# are not modeled; BN is folded in eval mode and dropout 0.0 is identity.


# ----------------------------------------------------------------------------
# Self-check of the conv kernel (exercises multi-row-block tiling and the
# fused pool path) against an f32 lax.conv reference.
# ----------------------------------------------------------------------------
def _self_check():
    key = jax.random.PRNGKey(42)
    kx, kp = jax.random.split(key)
    x = jax.random.normal(kx, (2, 16, 16, 32), jnp.float32)
    p = _conv_params(kp, [32], 64)
    xb = x.astype(jnp.bfloat16)
    y, yp = conv3x3([xb], p, act="relu", pool=True, max_rows=4)   # B = 4 blocks

    w = p["w"][0].astype(jnp.float32).reshape(3, 3, 32, 64)
    xr = xb.astype(jnp.float32)
    ref = jax.lax.conv_general_dilated(
        xr, w, (1, 1), "SAME",
        dimension_numbers=("NHWC", "HWIO", "NHWC"),
        precision=jax.lax.Precision.HIGHEST)
    ref = jnp.maximum(ref + p["b"].reshape(1, 1, 1, -1), 0.0)
    ref_p = jax.lax.reduce_window(ref, -jnp.inf, jax.lax.max,
                                  (1, 2, 2, 1), (1, 2, 2, 1), "VALID")
    err = float(jnp.max(jnp.abs(y.astype(jnp.float32) - ref)))
    err_p = float(jnp.max(jnp.abs(yp.astype(jnp.float32) - ref_p)))
    assert err < 0.1, f"conv3x3 mismatch: {err}"
    assert err_p < 0.1, f"fused maxpool mismatch: {err_p}"


if __name__ == "__main__":
    _self_check()

    key = jax.random.PRNGKey(0)
    kp, kx = jax.random.split(key)
    in_channels, out_classes = 1, 2
    params = init_unet_params(kp, in_channels, out_classes)
    # spatial=16 so that 4 pooling stages reach a 1x1 bottleneck cleanly
    x = jax.random.normal(kx, (2, in_channels, 16, 16), jnp.float32)

    fwd = jax.jit(functools.partial(unet_forward, out_classes=out_classes))
    out = fwd(x, params)
    jax.block_until_ready(out)
    assert out[0].shape == (2, out_classes, 16, 16), out[0].shape
    assert bool(jnp.all(jnp.isfinite(out[0])))
    print("KERNEL_OK")
</pallas_src>

<mosaic_0001>
module attributes {stable_mosaic.version = 11 : i64} {
  func.func @_conv3x3_kernel(%arg0: i32, %arg1: i32, %arg2: memref<1x128x32xbf16, #tpu.memory_space<vmem>>, %arg3: memref<3x96x64xbf16, #tpu.memory_space<vmem>>, %arg4: memref<1x64xf32, #tpu.memory_space<vmem>>, %arg5: memref<1x64x64xbf16, #tpu.memory_space<vmem>>, %arg6: memref<1x16x64xbf16, #tpu.memory_space<vmem>>) attributes {dimension_semantics = [#tpu.dimension_semantics<parallel>, #tpu.dimension_semantics<parallel>], iteration_bounds = array<i64: 1, 8>, scalar_prefetch = 0 : i64, scratch_operands = 0 : i64, tpu.core_type = #tpu.core_type<tc>, window_params = [{transform_indices = @transform_0, window_bounds = array<i64: 1, 128, 32>}, {transform_indices = @transform_1, window_bounds = array<i64: 3, 96, 64>}, {transform_indices = @transform_2, window_bounds = array<i64: 1, 64>}, {transform_indices = @transform_3, window_bounds = array<i64: 1, 64, 64>}, {transform_indices = @transform_4, window_bounds = array<i64: 1, 16, 64>}]} {
    %0 = tpu.iota {dimensions = array<i32: 0>} : vector<96x1xi32>
    %c16_i32 = arith.constant 16 : i32
    %c0_i32 = arith.constant 0 : i32
    %1 = arith.cmpi eq, %c16_i32, %c0_i32 : i32
    %c1_i32 = arith.constant 1 : i32
    %2 = arith.select %1, %c1_i32, %c16_i32 : i32
    %3 = vector.broadcast %2 : i32 to vector<96x1xi32>
    %4 = arith.remsi %0, %3 : vector<96x1xi32>
    %c0_i32_0 = arith.constant 0 : i32
    %5 = vector.broadcast %c0_i32_0 : i32 to vector<96x1xi32>
    %6 = arith.cmpi ne, %4, %5 : vector<96x1xi32>
    %c0_i32_1 = arith.constant 0 : i32
    %7 = vector.broadcast %c0_i32_1 : i32 to vector<96x1xi32>
    %8 = arith.cmpi slt, %4, %7 : vector<96x1xi32>
    %c0_i32_2 = arith.constant 0 : i32
    %9 = arith.cmpi slt, %2, %c0_i32_2 : i32
    %10 = vector.broadcast %9 : i1 to vector<96x1xi1>
    %11 = vector.broadcast %10 : vector<96x1xi1> to vector<96x1xi1>
    %12 = arith.xori %8, %11 : vector<96x1xi1>
    %13 = arith.andi %12, %6 : vector<96x1xi1>
    %14 = vector.broadcast %2 : i32 to vector<96x1xi32>
    %15 = arith.addi %4, %14 : vector<96x1xi32>
    %16 = arith.select %13, %15, %4 : vector<96x1xi1>, vector<96x1xi32>
    %c0_i32_3 = arith.constant 0 : i32
    %17 = vector.broadcast %c0_i32_3 : i32 to vector<96x1xi32>
    %18 = arith.cmpi ne, %16, %17 : vector<96x1xi32>
    %c15_i32 = arith.constant 15 : i32
    %19 = vector.broadcast %c15_i32 : i32 to vector<96x1xi32>
    %20 = arith.cmpi ne, %16, %19 : vector<96x1xi32>
    %cst = arith.constant 0.000000e+00 : f32
    %21 = vector.broadcast %cst : f32 to vector<64x64xf32>
    %c0 = arith.constant 0 : index
    %c16 = arith.constant 16 : index
    %c0_4 = arith.constant 0 : index
    %22 = vector.load %arg2[%c0, %c16, %c0_4] : memref<1x128x32xbf16, #tpu.memory_space<vmem>>, vector<1x96x32xbf16>
    %23 = vector.shape_cast %22 : vector<1x96x32xbf16> to vector<96x32xbf16>
    %c0_5 = arith.constant 0 : index
    %c15 = arith.constant 15 : index
    %c0_6 = arith.constant 0 : index
    %24 = vector.load %arg2[%c0_5, %c15, %c0_6] : memref<1x128x32xbf16, #tpu.memory_space<vmem>>, vector<1x96x32xbf16>
    %25 = vector.shape_cast %24 : vector<1x96x32xbf16> to vector<96x32xbf16>
    %cst_7 = arith.constant 0.000000e+00 : f32
    %26 = arith.truncf %cst_7 : f32 to bf16
    %27 = vector.shape_cast %18 : vector<96x1xi1> to vector<96x1xi1>
    %28 = vector.broadcast %27 : vector<96x1xi1> to vector<96x32xi1>
    %29 = vector.broadcast %26 : bf16 to vector<96x32xbf16>
    %30 = arith.select %28, %25, %29 : vector<96x32xi1>, vector<96x32xbf16>
    %c0_8 = arith.constant 0 : index
    %c17 = arith.constant 17 : index
    %c0_9 = arith.constant 0 : index
    %31 = vector.load %arg2[%c0_8, %c17, %c0_9] : memref<1x128x32xbf16, #tpu.memory_space<vmem>>, vector<1x96x32xbf16>
    %32 = vector.shape_cast %31 : vector<1x96x32xbf16> to vector<96x32xbf16>
    %cst_10 = arith.constant 0.000000e+00 : f32
    %33 = arith.truncf %cst_10 : f32 to bf16
    %34 = vector.shape_cast %20 : vector<96x1xi1> to vector<96x1xi1>
    %35 = vector.broadcast %34 : vector<96x1xi1> to vector<96x32xi1>
    %36 = vector.broadcast %33 : bf16 to vector<96x32xbf16>
    %37 = arith.select %35, %32, %36 : vector<96x32xi1>, vector<96x32xbf16>
    %38 = tpu.concatenate %30, %23, %37 in 1 : vector<96x32xbf16>, vector<96x32xbf16>, vector<96x32xbf16> -> vector<96x96xbf16>
    %39 = vector.extract_strided_slice %38 {offsets = [0, 0], sizes = [64, 96], strides = [1, 1]} : vector<96x96xbf16> to vector<64x96xbf16>
    %c0_11 = arith.constant 0 : index
    %c0_12 = arith.constant 0 : index
    %c0_13 = arith.constant 0 : index
    %40 = vector.load %arg3[%c0_11, %c0_12, %c0_13] : memref<3x96x64xbf16, #tpu.memory_space<vmem>>, vector<1x96x64xbf16>
    %41 = vector.shape_cast %40 : vector<1x96x64xbf16> to vector<96x64xbf16>
    %cst_14 = arith.constant dense<0.000000e+00> : vector<64x64xf32>
    %42 = tpu.matmul %39, %41, %cst_14 {dimension_numbers = #tpu.dot_dimension_numbers<[1], [0], [0], [1], [0, 0, 1, 1], [], []>} : vector<64x96xbf16>, vector<96x64xbf16>, vector<64x64xf32> -> vector<64x64xf32>
    %43 = arith.addf %21, %42 : vector<64x64xf32>
    %44 = vector.extract_strided_slice %38 {offsets = [16, 0], sizes = [64, 96], strides = [1, 1]} : vector<96x96xbf16> to vector<64x96xbf16>
    %c1 = arith.constant 1 : index
    %c0_15 = arith.constant 0 : index
    %c0_16 = arith.constant 0 : index
    %45 = vector.load %arg3[%c1, %c0_15, %c0_16] : memref<3x96x64xbf16, #tpu.memory_space<vmem>>, vector<1x96x64xbf16>
    %46 = vector.shape_cast %45 : vector<1x96x64xbf16> to vector<96x64xbf16>
    %cst_17 = arith.constant dense<0.000000e+00> : vector<64x64xf32>
    %47 = tpu.matmul %44, %46, %cst_17 {dimension_numbers = #tpu.dot_dimension_numbers<[1], [0], [0], [1], [0, 0, 1, 1], [], []>} : vector<64x96xbf16>, vector<96x64xbf16>, vector<64x64xf32> -> vector<64x64xf32>
    %48 = arith.addf %43, %47 : vector<64x64xf32>
    %49 = vector.extract_strided_slice %38 {offsets = [32, 0], sizes = [64, 96], strides = [1, 1]} : vector<96x96xbf16> to vector<64x96xbf16>
    %c2 = arith.constant 2 : index
    %c0_18 = arith.constant 0 : index
    %c0_19 = arith.constant 0 : index
    %50 = vector.load %arg3[%c2, %c0_18, %c0_19] : memref<3x96x64xbf16, #tpu.memory_space<vmem>>, vector<1x96x64xbf16>
    %51 = vector.shape_cast %50 : vector<1x96x64xbf16> to vector<96x64xbf16>
    %cst_20 = arith.constant dense<0.000000e+00> : vector<64x64xf32>
    %52 = tpu.matmul %49, %51, %cst_20 {dimension_numbers = #tpu.dot_dimension_numbers<[1], [0], [0], [1], [0, 0, 1, 1], [], []>} : vector<64x96xbf16>, vector<96x64xbf16>, vector<64x64xf32> -> vector<64x64xf32>
    %53 = arith.addf %48, %52 : vector<64x64xf32>
    %c0_21 = arith.constant 0 : index
    %c0_22 = arith.constant 0 : index
    %54 = vector.load %arg4[%c0_21, %c0_22] : memref<1x64xf32, #tpu.memory_space<vmem>>, vector<1x64xf32>
    %55 = vector.broadcast %54 : vector<1x64xf32> to vector<64x64xf32>
    %56 = arith.addf %53, %55 : vector<64x64xf32>
    %cst_23 = arith.constant 0.000000e+00 : f32
    %57 = vector.broadcast %cst_23 : f32 to vector<64x64xf32>
    %58 = arith.maximumf %56, %57 : vector<64x64xf32>
    %59 = arith.truncf %58 : vector<64x64xf32> to vector<64x64xbf16>
    %c0_24 = arith.constant 0 : index
    %c0_25 = arith.constant 0 : index
    %c0_26 = arith.constant 0 : index
    %60 = vector.load %arg5[%c0_24, %c0_25, %c0_26] : memref<1x64x64xbf16, #tpu.memory_space<vmem>>, vector<1x64x64xbf16>
    %61 = vector.shape_cast %60 : vector<1x64x64xbf16> to vector<64x64xbf16>
    %62 = vector.shape_cast %59 : vector<64x64xbf16> to vector<1x64x64xbf16>
    tpu.vector_store %arg5[%c0_24, %c0_25, %c0_26], %62 {strides = array<i32>} : memref<1x64x64xbf16, #tpu.memory_space<vmem>>, vector<1x64x64xbf16>,
    %63 = vector.shape_cast %58 : vector<64x64xf32> to vector<2x32x64xf32>
    %64 = vector.extract_strided_slice %63 {offsets = [0, 0, 0], sizes = [2, 16, 64], strides = [1, 1, 1]} : vector<2x32x64xf32> to vector<2x16x64xf32>
    %65 = vector.extract_strided_slice %63 {offsets = [0, 16, 0], sizes = [2, 16, 64], strides = [1, 1, 1]} : vector<2x32x64xf32> to vector<2x16x64xf32>
    %66 = arith.maximumf %64, %65 : vector<2x16x64xf32>
    %67 = vector.shape_cast %66 : vector<2x16x64xf32> to vector<16x2x64xf32>
    %68 = vector.extract_strided_slice %67 {offsets = [0, 0, 0], sizes = [16, 1, 64], strides = [1, 1, 1]} : vector<16x2x64xf32> to vector<16x1x64xf32>
    %69 = vector.shape_cast %68 : vector<16x1x64xf32> to vector<16x64xf32>
    %70 = vector.extract_strided_slice %67 {offsets = [0, 1, 0], sizes = [16, 1, 64], strides = [1, 1, 1]} : vector<16x2x64xf32> to vector<16x1x64xf32>
    %71 = vector.shape_cast %70 : vector<16x1x64xf32> to vector<16x64xf32>
    %72 = arith.maximumf %69, %71 : vector<16x64xf32>
    %73 = arith.truncf %72 : vector<16x64xf32> to vector<16x64xbf16>
    %c0_27 = arith.constant 0 : index
    %c0_28 = arith.constant 0 : index
    %c0_29 = arith.constant 0 : index
    %74 = vector.load %arg6[%c0_27, %c0_28, %c0_29] : memref<1x16x64xbf16, #tpu.memory_space<vmem>>, vector<1x16x64xbf16>
    %75 = vector.shape_cast %74 : vector<1x16x64xbf16> to vector<16x64xbf16>
    %76 = vector.shape_cast %73 : vector<16x64xbf16> to vector<1x16x64xbf16>
    tpu.vector_store %arg6[%c0_27, %c0_28, %c0_29], %76 {strides = array<i32>} : memref<1x16x64xbf16, #tpu.memory_space<vmem>>, vector<1x16x64xbf16>,
    return
  }
  func.func @transform_0(%arg0: i32, %arg1: i32) -> (i32, i32, i32) {
    %c0_i32 = arith.constant 0 : i32
    %c0_i32_0 = arith.constant 0 : i32
    %c0_i32_1 = arith.constant 0 : i32
    return %arg1, %c0_i32, %c0_i32_0 : i32, i32, i32
  }
  func.func @transform_1(%arg0: i32, %arg1: i32) -> (i32, i32, i32) {
    %c0_i32 = arith.constant 0 : i32
    %c0_i32_0 = arith.constant 0 : i32
    %c0_i32_1 = arith.constant 0 : i32
    return %c0_i32, %c0_i32_0, %arg0 : i32, i32, i32
  }
  func.func @transform_2(%arg0: i32, %arg1: i32) -> (i32, i32) {
    %c0_i32 = arith.constant 0 : i32
    %c0_i32_0 = arith.constant 0 : i32
    return %c0_i32, %arg0 : i32, i32
  }
  func.func @transform_3(%arg0: i32, %arg1: i32) -> (i32, i32, i32) {
    %c0_i32 = arith.constant 0 : i32
    %c0_i32_0 = arith.constant 0 : i32
    return %arg1, %c0_i32, %arg0 : i32, i32, i32
  }
  func.func @transform_4(%arg0: i32, %arg1: i32) -> (i32, i32, i32) {
    %c0_i32 = arith.constant 0 : i32
    %c0_i32_0 = arith.constant 0 : i32
    return %arg1, %c0_i32, %arg0 : i32, i32, i32
  }
}

</mosaic_0001>

<bundles_post_ra>
// kernel: tpu_custom_call.1
= control target key start
LH: loop header
LB: loop body
LE: loop exit
PB: predicated region body
PF: predicated region fallthrough
CT: control target
= control target key end

     0   :  { %10 = vsyncpa [#allocation3], 0  ;;  %s3390_s0 = inlined_call_operand.hbm [shape: bf16[8,128,32], index: 0, kind: input, shape index: {}]   ;;  %s3391_s1 = inlined_call_operand.hbm [shape: bf16[3,96,64], index: 1, kind: input, shape index: {}]   ;;  %s3392_s2 = inlined_call_operand.hbm [shape: f32[1,64], index: 2, kind: input, shape index: {}]   ;;  %s3393_s3 = inlined_call_operand.hbm [shape: bf16[8,64,64], index: 3, kind: output, shape index: {0}]   ;;  %s3394_s4 = inlined_call_operand.hbm [shape: bf16[8,16,64], index: 4, kind: output, shape index: {1}]  }
   0x1   :  { %12 = vsyncpa [#allocation3 + $0x1], 0 }
   0x2   :  { %13 = vsyncpa [#allocation6], 0 }
   0x3   :  { %14 = vsyncpa [#allocation4], 0 }
   0x4   :  { %16 = vsyncpa [#allocation4 + $0x1], 0 }
   0x5   :  { %17 = vsyncpa [#allocation10], 0 }
   0x6   :  { %19 = vsyncpa [#allocation10 + $0x1], 0  ;;  %s2655_s15 = smov 0   ;;  %s2657_s16 = smov 0  }
   0x7   :  { %s2659_s17 = smov 0   ;;  %s2661_s18 = smov 0  }
   0x8   :  { %s2663_s19 = smov 0   ;;  %s2665_s20 = smov 0  }
   0x9 LB: > { %s2032_s21 = sadd.s32 4294967295, %s2615_s20   ;;  %s2033_s22 = sadd.s32 4294967294, %s2615_s20   ;;  %s2615_s20 = sphi %s2665_s20, %s25_s20   ;;  %s2611_s19 = sphi %s2663_s19, %s3436_s19   ;;  %s2607_s18 = sphi %s2661_s18, %s3435_s18   ;;  %s2603_s17 = sphi %s2659_s17, %s3434_s17   ;;  %s2599_s16 = sphi %s2657_s16, %s3433_s16   ;;  %s2595_s15 = sphi %s2655_s15, %s3432_s15  }
   0xa   : > { %p57_p0 = scmp.ne.s32.totalorder %s2599_s16, %s2595_s15  ;;  %p2689_p1 = scmp.eq.s32.totalorder %s2032_s21, 0 }
   0xb   : > { %p2693_p2 = scmp.eq.s32.totalorder %s2032_s21, 7  ;;  %p141_p3 = scmp.eq.s32.totalorder %s2033_s22, 7 }
   0xc   : > { %s3399_s23 = scalar_select %p2689_p1, 1, 0 }
   0xd   : > { %s3400_s24 = scalar_select %p2693_p2, 1, 0 }
   0xe   : > { %p2699_p4 = por %p2689_p1, %p57_p0  ;;  %p2034_p5 = scmp.ge.s32.totalorder %s2615_s20, 1 }
   0xf   : > { %p2704_p6 = por %p141_p3, %p57_p0  ;;  %p176_p7 = scmp.lt.s32.totalorder %s2615_s20, 9 }
  0x10   : > { %s3401_s25 = scalar_select %p2699_p4, 1, 0 }
  0x11   : > { %s3402_s26 = scalar_select %p2704_p6, 1, 0 }
  0x12   : > { %p2709_p8 = pnand %p2034_p5, %p176_p7  ;;  %s2617_s28 = smov [#allocation5]  }
  0x13   : > { %s190_s29 = sshll.u32 %s2617_s28, 4  ;;  %s2618_s5 = smov [#allocation7]   ;;  %s191_s29 = int_to_ptr.vmem [resolvable:$true] %s190_s29 }
  0x14   : > { %s3403_s27 = scalar_select %p2709_p8, 1, 0 }
  0x15   : > { %p2305_p9 = pneg %p2709_p8  ;;  %s206_s6 = sshll.u32 %s2618_s5, 4  ;;  %s2721_s6 = int_to_ptr.vmem [resolvable:$true] %s206_s6 }
  0x16   : > { %s2411_s9 = scalar_lea.hbm %s3391_s1, 2304 }
  0x17   : > { %p2717_p10 = pnand %p2305_p9, %p2689_p1  ;;  %p2412_p11 = scmp.ne.s32.totalorder %s3391_s1, %s2411_s9 }
  0x18   : > { %p2418_p3 = scmp.lt.u32.totalorder %s2411_s9, %s3391_s1 }
  0x19   : > { %p2413_p12 = pneg %p2717_p10 }
  0x1b   : > { %p2414_p13 = pnand %p2413_p12, %p2412_p11 }
  0x1d   : > { %p2415_p0 = pneg %p2414_p13 }
  0x1f   : > { %p2420_p5 = pnand %p2418_p3, %p2415_p0 }
  0x21   : > { %2423 = shalt.err (!%p2420_p5)
}
  0x22   : > { %s2424_s14 = scalar_lea.vmem %s191_s29, 2304  ;;  %p2432_p1 = scmp.lt.s32.totalorder %s191_s29, %s191_s29 }
  0x23   : > { %p2425_p7 = scmp.ne.s32.totalorder %s191_s29, %s2424_s14  ;;  %p2433_p4 = scmp.lt.s32.totalorder %s2424_s14, %s2424_s14 }
  0x25   : > { %p2427_p9 = pnand %p2425_p7, %p2413_p12  ;;  %p2434_p8 = por %p2433_p4, %p2432_p1 }
  0x27   : > { %p2428_p6 = pneg %p2427_p9 }
  0x29   : > { %p2435_p2 = pnand %p2434_p8, %p2428_p6 }
  0x2b   : > { %2438 = shalt.err (!%p2435_p2)
}
  0x2c   : > { %s2619_s21 = smov 64   ;;  %s2620_s22 = smov 4  }
  0x2d   : > { %2308 = dma.hbm_to_vmem [thread:$0]  (!%p2717_p10), %s3391_s1, 2304, %s191_s29, [#allocation6], %s2619_s21, %s2619_s21, %s2620_s22  }
  0x2e   : > { %s2439_s9 = scalar_lea.hbm %s3392_s2, 16 }
  0x2f   : > { %p2440_p1 = scmp.ne.s32.totalorder %s3392_s2, %s2439_s9  ;;  %p2446_p6 = scmp.lt.u32.totalorder %s2439_s9, %s3392_s2 }
  0x31   : > { %p2442_p2 = pnand %p2440_p1, %p2413_p12 }
  0x33   : > { %p2443_p4 = pneg %p2442_p2 }
  0x35   : > { %p2448_p8 = pnand %p2446_p6, %p2443_p4 }
  0x37   : > { %2451 = shalt.err (!%p2448_p8)
}
  0x38   : > { %s2452_s29 = scalar_lea.vmem %s2721_s6, 16  ;;  %s2459_s14 = scalar_lea.vmem %s2721_s6, 32 }
  0x39   : > { %p2453_p11 = scmp.ne.s32.totalorder %s2721_s6, %s2452_s29  ;;  %p2460_p3 = scmp.lt.s32.totalorder %s2721_s6, %s2721_s6 }
  0x3a   : > { %p2461_p5 = scmp.lt.s32.totalorder %s2459_s14, %s2452_s29 }
  0x3b   : > { %p2455_p13 = pnand %p2453_p11, %p2413_p12 }
  0x3c   : > { %p2462_p7 = por %p2461_p5, %p2460_p3 }
  0x3d   : > { %p2456_p0 = pneg %p2455_p13 }
  0x3f   : > { %p2463_p9 = pnand %p2462_p7, %p2456_p0 }
  0x41   : > { %2466 = shalt.err (!%p2463_p9)
}
  0x42   : > { %2311 = dma.hbm_to_vmem [thread:$0]  (!%p2717_p10), %s3392_s2, 16, %s2721_s6, [#allocation6]  }
  0x43   : > { %s34_s7 = sadd.s32 1, %s2611_s19  ;;  %s44_s8 = sadd.s32 1, %s2603_s17 }
  0x44   : > { %p35_p12 = scmp.ge.s32.totalorder %s34_s7, 8  ;;  %p51_p1 = scmp.ne.s32.totalorder %s2603_s17, %s2599_s16 }
  0x45   : > { %p52_p2 = scmp.eq.s32.totalorder %s2615_s20, 0  ;;  %p2325_p4 = scmp.lt.s32.totalorder %s2615_s20, 8 }
  0x46   : > { %s3438_s7 = smov (%p35_p12, %s34_s7), 0  ;;  %p3405_p8 = scmp.ne.s32.totalorder %s3400_s24, 0 }
  0x47   : > { %p53_p6 = por %p52_p2, %p51_p1  ;;  %s41_s9 = ssub.s32 %s2611_s19, %s3438_s7 }
  0x48   : > { %p2784_p11 = por %p3405_p8, %p51_p1  ;;  %s217_s10 = sand.u32 1, %s2603_s17  }
  0x49   : > { %p42_p13 = scmp.eq.s32.totalorder %s41_s9, 0  ;;  %s2038_s6 = sshll.u32 %s217_s10, 6 }
  0x4a   : > { %s2146_s11 = sshll.u32 %s2611_s19, 10  ;;  %s221_s24 = scalar_lea.vmem [#allocation2], %s2038_s6 }
  0x4b   : > { %s2793_s12 = scalar_select %p42_p13, %s2603_s17, %s44_s8  }
  0x4c   : > { %s2798_s14 = scalar_lea.hbm %s3390_s0, %s2146_s11  ;;  %s228_s28 = sshll.u32 %s221_s24, 4  ;;  %s2806_s28 = int_to_ptr.vmem [resolvable:$true] %s228_s28 }
  0x4d   : > { %p2802_p10 = pnand %p2325_p4, %p53_p6  ;;  %s2808_s8 = scalar_lea.sflag [#allocation3], %s217_s10 }
  0x4e   : > { %s2467_s9 = scalar_lea.hbm %s2798_s14, 1024  ;;  %s2472_s13 = scalar_lea.hbm %s3390_s0, 8192 }
  0x4f   : > { %p2468_p0 = scmp.ne.s32.totalorder %s2798_s14, %s2467_s9  ;;  %p2469_p3 = pneg %p2802_p10 }
  0x50   : > { %p2473_p9 = scmp.lt.u32.totalorder %s2798_s14, %s3390_s0  ;;  %p2474_p12 = scmp.lt.u32.totalorder %s2472_s13, %s2467_s9 }
  0x51   : > { %p2470_p5 = pnand %p2469_p3, %p2468_p0  ;;  %p2476_p2 = scmp.lt.u32.totalorder %s2467_s9, %s2798_s14 }
  0x52   : > { %p2475_p1 = por %p2474_p12, %p2473_p9 }
  0x53   : > { %p2471_p7 = pneg %p2470_p5 }
  0x54   : > { %p2477_p4 = por %p2476_p2, %p2475_p1 }
  0x56   : > { %p2478_p6 = pnand %p2477_p4, %p2471_p7 }
  0x58   : > { %2481 = shalt.err (!%p2478_p6)
}
  0x59   : > { %s2482_s10 = scalar_lea.vmem %s2806_s28, 1024  ;;  %s2621_s6 = smov [#allocation2]  }
  0x5a   : > { %p2483_p8 = scmp.ne.s32.totalorder %s2806_s28, %s2482_s10  ;;  %s2487_s11 = sshll.u32 %s2621_s6, 4  ;;  %s2488_s11 = int_to_ptr.vmem [resolvable:$false] %s2487_s11 }
  0x5b   : > { %s2489_s29 = scalar_lea.vmem %s2488_s11, 2048  ;;  %p2490_p5 = scmp.lt.s32.totalorder %s2806_s28, %s2488_s11 }
  0x5c   : > { %p2485_p13 = pnand %p2483_p8, %p2469_p3  ;;  %p2491_p9 = scmp.lt.s32.totalorder %s2489_s29, %s2482_s10 }
  0x5e   : > { %p2486_p0 = pneg %p2485_p13  ;;  %p2492_p12 = por %p2491_p9, %p2490_p5 }
  0x60   : > { %p2493_p1 = pnand %p2492_p12, %p2486_p0 }
  0x62   : > { %2496 = shalt.err (!%p2493_p1)
}
  0x63   : > { %2315 = dma.hbm_to_vmem [thread:$0]  (!%p2802_p10), %s2798_s14, 1024, %s2806_s28, %s2808_s8, %s2619_s21, %s2619_s21, %s2620_s22  }
  0x64   : > { %p3408_p3 = scmp.ne.s32.totalorder %s3403_s27, 0 }
  0x65   : > { %s2842_s9 = sand.u32 (!%p3408_p3), 1, %s2599_s16   ;;  %p3409_p7 = scmp.ne.s32.totalorder (!%p3408_p3), %s3401_s25, 0 }
  0x66   : > { %240 = sbr.rel (%p3408_p3) target bundleno = 580 (0x244), region = 32  ;;  %s2042_s13 = sshll.u32 (!%p3408_p3), %s2842_s9, 6 }
  0x67   : > { %s243_s24 = scalar_lea.sflag (!%p3408_p3), [#allocation3], %s2842_s9  ;;  %s2846_s10 = scalar_lea.vmem (!%p3408_p3), [#allocation2], %s2042_s13 }
  0x6d   : > { %2578 = dma.done.wait (%p3409_p7), %s243_s24, 1024  }
  0x6e   : > { %2580 = vsyncadd (%p3409_p7), %s243_s24, 4294966272  ;;  %p3410_p10 = scmp.ne.s32.totalorder %s3399_s23, 0 }
  0x70   : > { %2582 = dma.done.wait (%p3410_p10), [#allocation6], 2320  }
  0x71   : > { %2584 = vsyncadd (%p3410_p10), [#allocation6], 4294964976  ;;  %v287_v0 = vlaneseq  ;;  %vm2622_vm0 = vmmov 1   ;;  %v2623_v2 = vmov 0   ;;  %vm726_vm2 = vsmask.f32 256 }
  0x72   : > { %vm506_vm1 = vmpackc.low %vm2622_vm0, %vm2622_vm0  ;;  %vm727_vm3 = vsmask.f32 4368  ;;  %vm529_vm4 = vsmask.f32 3328  ;;  %v2887_v18 = vld [vmem:[%s2846_s10 + $0x8] sm:$0xf] }
  0x73   : > { %v2856_v1 = vshrl.u32 %v287_v0, 7  ;;  %v2859_v3 = vsel %vm506_vm1, 65537, %v2623_v2  ;;  %v2890_v19 = vld [vmem:[%s2846_s10 + $0xc] sm:$0xf]  ;;  %v2893_v20 = vld [vmem:[%s2846_s10 + $0x10] sm:$0xf]  ;;  %vm2953_vm8 = vmor %vm726_vm2, %vm727_vm3 }
  0x74   : > { %v542_v4 = vshll.u32 %v2859_v3, 16  ;;  %v546_v5 = vshrl.u32 %v2859_v3, 16  ;;  %v2054_v22 = vcombine.low %v2887_v18, %v2890_v19  ;;  %v2900_v23 = vld [vmem:[%s2846_s10 + $0x14] sm:$0xf]  ;;  %v2903_v24 = vld [vmem:[%s2846_s10 + $0x18] sm:$0xf] }
  0x75   : > { %v289_v6 = vadd.s32 8, %v2856_v1  ;;  %v2865_v7 = vadd.s32 24, %v2856_v1  ;;  %v2868_v8 = vadd.s32 40, %v2856_v1  ;;  %v2871_v9 = vadd.s32 56, %v2856_v1  ;;  %v2906_v25 = vld [vmem:[%s2846_s10 + $0x1c] sm:$0xf] }
  0x76   : > { %v2873_v10 = vrot.slane %v542_v4, 5  ;;  %v732_v11 = vrot.slane %v546_v5, 7  ;;  %v2878_v12 = vadd.s32 72, %v2856_v1  ;;  %v2881_v13 = vadd.s32 88, %v2856_v1  ;;  %v2913_v28 = vld [vmem:[%s2846_s10 + $0x20] sm:$0xf] }
  0x77   : > { %v311_v14 = vand.u32 15, %v289_v6  ;;  %v325_v15 = vand.u32 15, %v2865_v7  ;;  %v339_v16 = vand.u32 15, %v2868_v8  ;;  %v353_v17 = vand.u32 15, %v2871_v9  ;;  %v2916_v29 = vld [vmem:[%s2846_s10 + $0x24] sm:$0xf] }
  0x78   : > { %v2895_v21 = vor.u32 %v732_v11, %v542_v4  ;;  %v2055_v26 = vcombine.low %v2893_v20, %v2900_v23  ;;  %v2056_v27 = vcombine.low %v2903_v24, %v2906_v25  ;;  %v2922_v31 = vrot.slane %v732_v11, 4  ;;  %v2393_v35 = vld [vmem:[#allocation5] sm:$0xff]   ;;  %v2931_v48 = vld [vmem:[%s2846_s10 + $0x28] sm:$0xf]  ;;  %v2934_v49 = vld [vmem:[%s2846_s10 + $0x2c] sm:$0xf] }
  0x79   : > { %vm2918_vm5 = vcmp.ne.s32.totalorder %v311_v14, 15  ;;  %v926_v32 = vshrl.u32 %v2054_v22, 16  ;;  %v929_v33 = vshll.u32 %v2054_v22, 16  ;;  %v2057_v34 = vcombine.low %v2913_v28, %v2916_v29  ;;  %2223 = vmatprep.subr.bf16.mxu0 %v2393_v35  ;;  %v2937_v50 = vld [vmem:[%s2846_s10 + $0x30] sm:$0xf]  ;;  %s2624_s23 = smov 32  }
  0x7a   : > { %vm836_vm6 = vcmp.ne.s16.totalorder %v2895_v21, 0  ;;  %v934_v36 = vshrl.u32 %v2055_v26, 16  ;;  %v937_v37 = vshll.u32 %v2055_v26, 16  ;;  %v943_v38 = vshrl.u32 %v2056_v27, 16  ;;  %vm703_vm7 = vmpackc.low %vm2918_vm5, %vm2918_vm5  ;;  %2224 = vmatpush3.bf16.msra.mxu0 %v2393_v35  ;;  %v2946_v55 = vld [vmem:[%s2846_s10 + $0x34] sm:$0xf] }
  0x7b   : > { %v946_v39 = vshll.u32 %v2056_v27, 16  ;;  %v928_v40 = vrot.slane %v926_v32, 4  ;;  %v931_v41 = vrot.slane %v929_v33, 5  ;;  %v952_v42 = vshrl.u32 %v2057_v34, 16  ;;  %v2394_v56 = vld [vmem:[#allocation5 + $0x30] sm:$0xff]   ;;  %v2395_v4 = vld [vmem:[#allocation5 + $0x8] sm:$0xff]  }
  0x7c   : > { %v955_v43 = vshll.u32 %v2057_v34, 16  ;;  %v936_v44 = vrot.slane %v934_v36, 4  ;;  %v939_v45 = vrot.slane %v937_v37, 5  ;;  %v945_v46 = vrot.slane %v943_v38, 4  ;;  %2203 = vmatprep.subr.bf16.mxu1 %v2394_v56  ;;  %2225 = vmatprep.subr.bf16.mxu0 %v2395_v4  ;;  %v2396_v30 = vld [vmem:[#allocation5 + $0x38] sm:$0xff]   ;;  %s2625_s25 = smov 64  }
  0x7d   : > { %v948_v47 = vrot.slane %v946_v39, 5  ;;  %v932_v51 = vor.u32 %v931_v41, %v928_v40  ;;  %v954_v52 = vrot.slane %v952_v42, 4  ;;  %v715_v54 = vsel %vm703_vm7, 65537, %v2623_v2  ;;  %2204 = vmatpush3.bf16.msra.mxu1 %v2394_v56  ;;  %v2397_v42 = vld [vmem:[#allocation5 + $0x10] sm:$0xff]   ;;  %s2045_s27 = sshll.u32 %s2842_s9, 5  ;;  %s2171_s22 = sshll.u32 %s2607_s18, 9 }
  0x7e   : > { %v957_v53 = vrot.slane %v955_v43, 5  ;;  %v940_v57 = vor.u32 %v939_v45, %v936_v44  ;;  %v738_v59 = vshrl.u32 %v715_v54, 16  ;;  %v741_v60 = vshll.u32 %v715_v54, 16  ;;  %2226 = vmatpush3.bf16.msra.mxu0 %v2395_v4  ;;  %2205 = vmatprep.subr.bf16.mxu1 %v2396_v30  ;;  %v2398_v43 = vld [vmem:[#allocation5 + $0x40] sm:$0xff]   ;;  %s3239_s21 = scalar_lea.vmem [#allocation8], %s2045_s27  ;;  %s3278_s8 = scalar_lea.hbm %s3393_s3, %s2171_s22 }
  0x7f   : > { %v949_v58 = vor.u32 %v948_v47, %v945_v46  ;;  %978 = vrot.lane.b32.xlu0 %v932_v51, %s2624_s23  ;;  %v849_v63 = vsel %vm836_vm6, %v2887_v18, 0  ;;  %vm459_vm9 = vcmp.ne.s32.totalorder %v325_v15, 15  ;;  %vm2960_vm10 = vcmp.ne.s32.totalorder %v339_v16, 15  ;;  %2227 = vmatprep.subr.bf16.mxu0 %v2397_v42  ;;  %s1875_s14 = sshll.u32 %s3239_s21, 4  ;;  %s1856_s6 = scalar_lea.sflag [#allocation4], %s2842_s9  ;;  %s3282_s14 = int_to_ptr.vmem [resolvable:$true] %s1875_s14 }
  0x80   : > { %v2949_v61 = vor.u32 %v957_v53, %v954_v52  ;;  %v941_v7 = vsel %vm529_vm4, %v932_v51, %v940_v57  ;;  %v740_v8 = vrot.slane %v738_v59, 7  ;;  %vm705_vm11 = vmpackc.low %vm459_vm9, %vm459_vm9  ;;  %vm2966_vm12 = vcmp.ne.s32.totalorder %v353_v17, 15  ;;  %v2399_v51 = vld [vmem:[#allocation5 + $0x18] sm:$0xff]   ;;  %s2497_s11 = scalar_lea.vmem %s3282_s14, 512  ;;  %s2627_s29 = smov [#allocation8]  }
  0x81   : > { %v950_v6 = vsel %vm529_vm4, %v940_v57, %v949_v58  ;;  %v717_v14 = vsel %vm705_vm11, 65537, %v2623_v2  ;;  %vm707_vm13 = vmpackc.low %vm2960_vm10, %vm2960_vm10  ;;  %v2058_v15 = vcombine.low %v2931_v48, %v2934_v49  ;;  %v2981_v16 = vcombine.low %v2937_v50, %v2946_v55  ;;  %2206 = vmatpush3.bf16.msra.mxu1 %v2396_v30  ;;  %v2400_v57 = vld [vmem:[#allocation5 + $0x48] sm:$0xff]   ;;  %p2498_p2 = scmp.ne.s32.totalorder %s3282_s14, %s2497_s11  ;;  %s2501_s13 = sshll.u32 %s2627_s29, 4  ;;  %s2502_s13 = int_to_ptr.vmem [resolvable:$false] %s2501_s13 }
  0x82   : > { %982 = vrot.lane.b32.xlu1 %v950_v6, %s2624_s23  ;;  %v959_v11 = vsel %vm529_vm4, %v949_v58, %v2949_v61  ;;  %v743_v17 = vor.u32 %v741_v60, %v740_v8  ;;  %v745_v22 = vrot.slane %v740_v8, 4  ;;  %v756_v26 = vshrl.u32 %v717_v14, 16  ;;  %vm709_vm14 = vmpackc.low %vm2966_vm12, %vm2966_vm12  ;;  %2207 = vmatprep.subr.bf16.mxu1 %v2398_v43  ;;  %v2401_v6 = vld [vmem:[#allocation5 + $0x20] sm:$0xff]   ;;  %s2503_s24 = scalar_lea.vmem %s2502_s13, 1024  ;;  %p2504_p8 = scmp.lt.s32.totalorder %s3282_s14, %s2502_s13 }
  0x83   : > { %v759_v27 = vshll.u32 %v717_v14, 16  ;;  %980 = vrot.lane.b32.xlu0 %v941_v7, %s2624_s23  ;;  %v719_v32 = vsel %vm707_vm13, 65537, %v2623_v2  ;;  %v721_v33 = vsel %vm709_vm14, 65537, %v2623_v2  ;;  %v961_v34 = vshrl.u32 %v2058_v15, 16  ;;  %2228 = vmatpush3.bf16.msra.mxu0 %v2397_v42  ;;  %v2402_v14 = vld [vmem:[#allocation5 + $0x50] sm:$0xff]   ;;  %p2499_p4 = pnand %p2498_p2, %p2784_p11  ;;  %p2505_p13 = scmp.lt.s32.totalorder %s2503_s24, %s2497_s11 }
  0x84   : > { %v964_v35 = vshll.u32 %v2058_v15, 16  ;;  %v744_v36 = vsel %vm2953_vm8, %v2922_v31, %v743_v17  ;;  %v753_v37 = vsel %vm2953_vm8, %v745_v22, %v2895_v21  ;;  %v758_v38 = vrot.slane %v756_v26, 7  ;;  %2229 = vmatprep.subr.bf16.mxu0 %v2399_v51 }
  0x85   : > { %vm1025_vm15 = vcmask 1042432   ;;  %v774_v39 = vshrl.u32 %v719_v32, 16  ;;  %vm837_vm0 = vcmp.ne.s16.totalorder %v744_v36, 0  ;;  %vm838_vm1 = vcmp.ne.s16.totalorder %v753_v37, 0  ;;  %2208 = vmatpush3.bf16.msra.mxu1 %v2398_v43  ;;  %p2500_p6 = pneg %p2499_p4  ;;  %p2506_p0 = por %p2505_p13, %p2504_p8 }
  0x86   : > { %984 = vrot.lane.b32.xlu1 %v959_v11, %s2624_s23  ;;  %v777_v40 = vshll.u32 %v719_v32, 16  ;;  %v792_v41 = vshrl.u32 %v721_v33, 16  ;;  %v850_v44 = vsel %vm837_vm0, %v2890_v19, 0  ;;  %v761_v45 = vor.u32 %v759_v27, %v758_v38  ;;  %2209 = vmatprep.subr.bf16.mxu1 %v2400_v57 }
  0x87   : > { %v851_v46 = vsel %vm838_vm1, %v2893_v20, 0  ;;  %v763_v47 = vrot.slane %v758_v38, 4  ;;  %v2060_v52 = vcombine.low %v849_v63, %v850_v44  ;;  %v776_v53 = vrot.slane %v774_v39, 7  ;;  %2230 = vmatpush3.bf16.msra.mxu0 %v2399_v51  ;;  %v2403_v39 = vld [vmem:[#allocation5 + $0x28] sm:$0xff]   ;;  %p2507_p5 = pnand %p2506_p0, %p2500_p6 }
  0x88   : > { %v2998_v54 = vrot.slane %v792_v41, 7  ;;  %v795_v56 = vshll.u32 %v721_v33, 16  ;;  %v762_v58 = vsel %vm2953_vm8, %v2922_v31, %v761_v45  ;;  %v963_v60 = vrot.slane %v961_v34, 4  ;;  %2231 = vmatprep.subr.bf16.mxu0 %v2401_v6 }
  0x89   : > { %v771_v59 = vsel %vm2953_vm8, %v763_v47, %v2895_v21  ;;  %v966_v0 = vrot.slane %v964_v35, 5  ;;  %v1026_v4 = vrot.slane %v2060_v52, 5  ;;  %vm839_vm2 = vcmp.ne.s16.totalorder %v762_v58, 0  ;;  %2210 = vmatpush3.bf16.msra.mxu1 %v2400_v57 }
  0x8a   : > { %v779_v63 = vor.u32 %v777_v40, %v776_v53  ;;  %vm840_vm3 = vcmp.ne.s16.totalorder %v771_v59, 0  ;;  %v852_v7 = vsel %vm839_vm2, %v2900_v23, 0  ;;  %v781_v9 = vrot.slane %v776_v53, 4  ;;  %2211 = vmatprep.subr.bf16.mxu1 %v2402_v14  ;;  %v2404_v40 = vld [vmem:[#allocation5 + $0x58] sm:$0xff]  }
  0x8b   : > { %v853_v8 = vsel %vm840_vm3, %v2903_v24, 0  ;;  %v797_v11 = vor.u32 %v795_v56, %v2998_v54  ;;  %1039 = vrot.lane.b32.xlu0 %v1026_v4, %s2625_s25  ;;  %v2061_v15 = vcombine.low %v851_v46, %v852_v7  ;;  %v967_v22 = vor.u32 %v966_v0, %v963_v60  ;;  %2232 = vmatpush3.bf16.msra.mxu0 %v2401_v6  ;;  %v3038_v56 = vld [vmem:[#allocation5 + $0x60] sm:$0xff]  }
  0x8c   : > { %v780_v17 = vsel %vm2953_vm8, %v2922_v31, %v779_v63  ;;  %v970_v26 = vshrl.u32 %v2981_v16, 16  ;;  %v789_v27 = vsel %vm2953_vm8, %v781_v9, %v2895_v21  ;;  %v973_v32 = vshll.u32 %v2981_v16, 16  ;;  %2233 = vmatprep.subr.bf16.mxu0 %v2403_v39 }
  0x8d   : > { %vm841_vm5 = vcmp.ne.s16.totalorder %v780_v17, 0  ;;  %v798_v30 = vsel %vm2953_vm8, %v2922_v31, %v797_v11  ;;  %v1027_v33 = vrot.slane %v2061_v15, 5  ;;  %vm842_vm6 = vcmp.ne.s16.totalorder %v789_v27, 0  ;;  %2212 = vmatpush3.bf16.msra.mxu1 %v2402_v14 }
  0x8e   : > { %v854_v34 = vsel %vm841_vm5, %v2906_v25, 0  ;;  %vm843_vm7 = vcmp.ne.s16.totalorder %v798_v30, 0  ;;  %v855_v36 = vsel %vm842_vm6, %v2913_v28, 0  ;;  %v968_v38 = vsel %vm529_vm4, %v2949_v61, %v967_v22  ;;  %2213 = vmatprep.subr.bf16.mxu1 %v2404_v40 }
  0x8f   : > { %v2062_v35 = vcombine.low %v853_v8, %v854_v34  ;;  %v856_v37 = vsel %vm843_vm7, %v2916_v29, 0  ;;  %v1028_v16 = vsel %vm1025_vm15, %v1026_v4, %v1027_v33  ;;  %v972_v42 = vrot.slane %v970_v26, 4  ;;  %2234 = vmatpush3.bf16.msra.mxu0 %v2403_v39 }
  0x90   : > { %v3027_v41 = vcombine.low %v855_v36, %v856_v37  ;;  %v975_v43 = vrot.slane %v973_v32, 5  ;;  %1041 = vrot.lane.b32.xlu1 %v1028_v16, %s2625_s25  ;;  %v367_v45 = vand.u32 15, %v2878_v12  ;;  %v799_v46 = vrot.slane %v2998_v54, 4  ;;  %2243 = vmatprep.subr.bf16.mxu0 %v3038_v56 }
  0x91   : > { %v1029_v44 = vrot.slane %v2062_v35, 5  ;;  %v381_v47 = vand.u32 15, %v2881_v13  ;;  %v304_v52 = vand.u32 15, %v2856_v1  ;;  %v292_v53 = vadd.s32 32, %v2856_v1  ;;  %2214 = vmatpush3.bf16.msra.mxu1 %v2404_v40 }
  0x92   : > { %v1031_v61 = vrot.slane %v3027_v41, 5  ;;  %v3034_v51 = vor.u32 %v975_v43, %v972_v42  ;;  %vm530_vm9 = vsmask.f32 7440  ;;  %vm465_vm10 = vcmp.ne.s32.totalorder %v367_v45, 15  ;;  %2263 = vmatprep.subr.bf16.mxu1 %v3038_v56 }
  0x93   : > { %v1030_v12 = vsel %vm1025_vm15, %v1027_v33, %v1029_v44  ;;  %v807_v13 = vsel %vm2953_vm8, %v799_v46, %v2895_v21  ;;  %vm3044_vm11 = vcmp.ne.s32.totalorder %v381_v47, 15  ;;  %vm711_vm12 = vmpackc.low %vm465_vm10, %vm465_vm10  ;;  %vm3054_vm14 = vcmp.ne.s32.totalorder %v304_v52, 0  ;;  %v480_v46 = vld [vmem:[%s2846_s10 + $0x4] sm:$0x8] }
  0x94   : > { %1043 = vrot.lane.b32.xlu0 %v1030_v12, %s2625_s25  ;;  %v1032_v57 = vsel %vm1025_vm15, %v1029_v44, %v1031_v61  ;;  %v977_v58 = vsel %vm529_vm4, %v967_v22, %v3034_v51  ;;  %vm844_vm13 = vcmp.ne.s16.totalorder %v807_v13, 0  ;;  %v723_v60 = vsel %vm711_vm12, 65537, %v2623_v2  ;;  %vm713_vm0 = vmpackc.low %vm3044_vm11, %vm3044_vm11 }
  0x95   : > { %1045 = vrot.lane.b32.xlu1 %v1032_v57, %s2625_s25  ;;  %v857_v0 = vsel %vm844_vm13, %v2931_v48, 0  ;;  %v332_v4 = vand.u32 15, %v292_v53  ;;  %v548_v63 = vrot.slane %v546_v5, 4  ;;  %v810_v6 = vshrl.u32 %v723_v60, 16  ;;  %vm505_vm1 = vmpackc.low %vm3054_vm14, %vm3054_vm14 }
  0x96   : > { %v813_v7 = vshll.u32 %v723_v60, 16  ;;  %v725_v8 = vsel %vm713_vm0, 65537, %v2623_v2  ;;  %v290_v9 = vadd.s32 16, %v2856_v1  ;;  %v517_v15 = vsel %vm505_vm1, 65537, %v2623_v2  ;;  %vm3094_vm11 = vmor %vm529_vm4, %vm530_vm9 }
  0x97   : > { %v828_v11 = vshrl.u32 %v725_v8, 16  ;;  %v831_v14 = vshll.u32 %v725_v8, 16  ;;  %vm448_vm2 = vcmp.ne.s32.totalorder %v332_v4, 0  ;;  %v812_v3 = vrot.slane %v810_v6, 7 }
  0x98   : > { %986 = vrot.lane.b32.xlu0 %v968_v38, %s2624_s23  ;;  %v533_v5 = vshll.u32 %v517_v15, 16  ;;  %v536_v17 = vshrl.u32 %v517_v15, 16  ;;  %vm509_vm3 = vmpackc.low %vm448_vm2, %vm448_vm2  ;;  %v549_v22 = vor.u32 %v548_v63, %v2873_v10  ;;  %v318_v30 = vand.u32 15, %v290_v9  ;;  %v677_v38 = vld [vmem:[%s2846_s10 + $0x38] sm:$0x1] }
  0x99   : > { %988 = vrot.lane.b32.xlu1 %v977_v58, %s2624_s23  ;;  %v830_v26 = vrot.slane %v828_v11, 7  ;;  %v521_v27 = vsel %vm509_vm3, 65537, %v2623_v2  ;;  %v294_v32 = vadd.s32 48, %v2856_v1  ;;  %v815_v33 = vor.u32 %v813_v7, %v812_v3 }
  0x9a   : > { %v817_v34 = vrot.slane %v812_v3, 4  ;;  %v535_v35 = vrot.slane %v533_v5, 5  ;;  %v538_v36 = vrot.slane %v536_v17, 4  ;;  %v3080_v40 = vrot.slane %v549_v22, 4 }
  0x9b   : > { %v833_v37 = vor.u32 %v831_v14, %v830_v26  ;;  %v835_v39 = vrot.slane %v830_v26, 4  ;;  %v572_v16 = vshll.u32 %v521_v27, 16  ;;  %v816_v42 = vsel %vm2953_vm8, %v2922_v31, %v815_v33 }
  0x9c   : > { %v825_v43 = vsel %vm2953_vm8, %v817_v34, %v2895_v21  ;;  %v539_v44 = vor.u32 %v538_v36, %v535_v35  ;;  %vm651_vm5 = vcmp.ne.s16.totalorder %v535_v35, 0  ;;  %vm845_vm6 = vcmp.ne.s16.totalorder %v816_v42, 0 }
  0x9d   : > { %v834_v45 = vsel %vm2953_vm8, %v2922_v31, %v833_v37  ;;  %vm846_vm7 = vcmp.ne.s16.totalorder %v825_v43, 0  ;;  %vm848_vm10 = vcmp.ne.s16.totalorder %v835_v39, 0  ;;  %v858_v52 = vsel %vm845_vm6, %v2934_v49, 0 }
  0x9e   : > { %vm847_vm12 = vcmp.ne.s16.totalorder %v834_v45, 0  ;;  %v859_v21 = vsel %vm846_vm7, %v2937_v50, 0  ;;  %v861_v53 = vsel %vm848_vm10, %v677_v38, 0  ;;  %v2064_v12 = vcombine.low %v857_v0, %v858_v52 }
  0x9f   : > { %v860_v13 = vsel %vm847_vm12, %v2946_v55, 0  ;;  %v2066_v62 = vcombine.low %v861_v53, %v861_v53  ;;  %v540_v31 = vrot.slane %v539_v44, 4  ;;  %v664_v57 = vsel %vm651_vm5, %v480_v46, 0 }
  0xa0   : > { %v2065_v54 = vcombine.low %v859_v21, %v860_v13  ;;  %v574_v58 = vrot.slane %v572_v16, 5  ;;  %v576_v59 = vshrl.u32 %v521_v27, 16  ;;  %v1033_v60 = vrot.slane %v2064_v12, 5 }
  0xa1   : > { %v1037_v4 = vrot.slane %v2066_v62, 5  ;;  %v545_v63 = vsel %vm3094_vm11, %v540_v31, %v2873_v10  ;;  %vm446_vm4 = vcmp.ne.s32.totalorder %v318_v30, 0  ;;  %v346_v17 = vand.u32 15, %v294_v32 }
  0xa2   : > { %v1035_v6 = vrot.slane %v2065_v54, 5  ;;  %vm652_vm8 = vcmp.ne.s16.totalorder %v545_v63, 0  ;;  %v575_v0 = vsel %vm3094_vm11, %v3080_v40, %v574_v58  ;;  %v578_v7 = vrot.slane %v576_v59, 4  ;;  %vm507_vm9 = vmpackc.low %vm446_vm4, %vm446_vm4 }
  0xa3   : > { %v1034_v8 = vsel %vm1025_vm15, %v1031_v61, %v1033_v60  ;;  %v665_v9 = vsel %vm652_vm8, %v2887_v18, 0  ;;  %vm3112_vm13 = vcmp.ne.s16.totalorder %v575_v0, 0  ;;  %v519_v14 = vsel %vm507_vm9, 65537, %v2623_v2 }
  0xa4   : > { %1047 = vrot.lane.b32.xlu0 %v1034_v8, %s2625_s25  ;;  %v1036_v15 = vsel %vm1025_vm15, %v1033_v60, %v1035_v6  ;;  %v3119_v3 = vcombine.low %v664_v57, %v665_v9  ;;  %v579_v5 = vor.u32 %v578_v7, %v574_v58  ;;  %v668_v41 = vsel %vm3112_vm13, %v2900_v23, 0 }
  0xa5   : > { %1049 = vrot.lane.b32.xlu1 %v1036_v15, %s2625_s25  ;;  %v552_v18 = vshll.u32 %v519_v14, 16  ;;  %v556_v61 = vshrl.u32 %v519_v14, 16  ;;  %v1038_v22 = vsel %vm1025_vm15, %v1035_v6, %v1037_v4  ;;  %v296_v27 = vadd.s32 64, %v2856_v1 }
  0xa6   : > { %v580_v26 = vrot.slane %v579_v5, 4  ;;  %v298_v30 = vadd.s32 80, %v2856_v1  ;;  %vm450_vm14 = vcmp.ne.s32.totalorder %v346_v17, 0  ;;  %vm663_vm6 = vcmp.ne.s16.totalorder %v3080_v40, 0 }
  0xa7   : > { %v554_v33 = vrot.slane %v552_v18, 5  ;;  %v558_v34 = vrot.slane %v556_v61, 4  ;;  %vm511_vm0 = vmpackc.low %vm450_vm14, %vm450_vm14  ;;  %v360_v35 = vand.u32 15, %v296_v27  ;;  %v3154_v53 = vsel %vm663_vm6, %v2946_v55, 0 }
  0xa8   : > { %990 = vrot.lane.b32.xlu0 %v3034_v51, %s2624_s23  ;;  %v585_v23 = vsel %vm3094_vm11, %v580_v26, %v2873_v10  ;;  %v374_v32 = vand.u32 15, %v298_v30  ;;  %v523_v38 = vsel %vm511_vm0, 65537, %v2623_v2  ;;  %vm1053_vm0 = vcmask 261120  }
  0xa9   : > { %1051 = vrot.lane.b32.xlu1 %v1038_v22, %s2625_s25  ;;  %vm656_vm15 = vcmp.ne.s16.totalorder %v585_v23, 0  ;;  %v555_v36 = vsel %vm3094_vm11, %v3080_v40, %v554_v33  ;;  %v559_v37 = vor.u32 %v558_v34, %v554_v33  ;;  %v592_v16 = vshll.u32 %v523_v38, 16 }
  0xaa   : > { %v669_v39 = vsel %vm656_vm15, %v2903_v24, 0  ;;  %vm3139_vm1 = vcmp.ne.s16.totalorder %v555_v36, 0  ;;  %v596_v42 = vshrl.u32 %v523_v38, 16  ;;  %vm452_vm2 = vcmp.ne.s32.totalorder %v360_v35, 0 }
  0xab   : > { %v3143_v43 = vcombine.low %v668_v41, %v669_v39  ;;  %v560_v44 = vrot.slane %v559_v37, 4  ;;  %v666_v45 = vsel %vm3139_vm1, %v2890_v19, 0  ;;  %v594_v46 = vrot.slane %v592_v16, 5  ;;  %vm513_vm3 = vmpackc.low %vm452_vm2, %vm452_vm2 }
  0xac   : > { %v598_v52 = vrot.slane %v596_v42, 4  ;;  %vm454_vm5 = vcmp.ne.s32.totalorder %v374_v32, 0  ;;  %v525_v21 = vsel %vm513_vm3, 65537, %v2623_v2  ;;  %vm1075_vm15 = vcmask 523264  }
  0xad   : > { %v565_v24 = vsel %vm3094_vm11, %v560_v44, %v2873_v10  ;;  %vm515_vm7 = vmpackc.low %vm454_vm5, %vm454_vm5  ;;  %v595_v19 = vsel %vm3094_vm11, %v3080_v40, %v594_v46  ;;  %v612_v13 = vshll.u32 %v525_v21, 16  ;;  %v616_v54 = vshrl.u32 %v525_v21, 16 }
  0xae   : > { %vm654_vm10 = vcmp.ne.s16.totalorder %v565_v24, 0  ;;  %v599_v12 = vor.u32 %v598_v52, %v594_v46  ;;  %vm3160_vm12 = vcmp.ne.s16.totalorder %v595_v19, 0  ;;  %v527_v57 = vsel %vm515_vm7, 65537, %v2623_v2 }
  0xaf   : > { %v667_v62 = vsel %vm654_vm10, %v2893_v20, 0  ;;  %v670_v55 = vsel %vm3160_vm12, %v2906_v25, 0  ;;  %v614_v60 = vrot.slane %v612_v13, 5  ;;  %v618_v4 = vrot.slane %v616_v54, 4 }
  0xb0   : > { %v2048_v58 = vcombine.low %v666_v45, %v667_v62  ;;  %v600_v59 = vrot.slane %v599_v12, 4  ;;  %v632_v63 = vshll.u32 %v527_v57, 16  ;;  %v636_v6 = vshrl.u32 %v527_v57, 16 }
  0xb1   : > { %v615_v0 = vsel %vm3094_vm11, %v3080_v40, %v614_v60  ;;  %v619_v2 = vor.u32 %v618_v4, %v614_v60  ;;  %vm1191_vm1 = vcmask 785408   ;;  %v2406_v60 = vld [vmem:[#allocation5 + $0x68] sm:$0xff]   ;;  %vm1569_vm2 = vcmask 519168  }
  0xb2   : > { %v605_v20 = vsel %vm3094_vm11, %v600_v59, %v2873_v10  ;;  %vm659_vm8 = vcmp.ne.s16.totalorder %v615_v0, 0  ;;  %v634_v7 = vrot.slane %v632_v63, 5  ;;  %v638_v9 = vrot.slane %v636_v6, 4 }
  0xb3   : > { %vm658_vm4 = vcmp.ne.s16.totalorder %v605_v20, 0  ;;  %v672_v25 = vsel %vm659_vm8, %v2916_v29, 0  ;;  %v620_v14 = vrot.slane %v619_v2, 4  ;;  %v2407_v20 = vld [vmem:[#allocation5 + $0x70] sm:$0xff]   ;;  %vm1815_vm3 = vcmask 1041409  }
  0xb4   : > { %v671_v8 = vsel %vm658_vm4, %v2913_v28, 0  ;;  %v635_v15 = vsel %vm3094_vm11, %v3080_v40, %v634_v7  ;;  %v639_v5 = vor.u32 %v638_v9, %v634_v7  ;;  %v2408_v7 = vld [vmem:[#allocation5 + $0x78] sm:$0xff]   ;;  %vm1818_vm5 = vcmask 1042434  }
  0xb5   : > { %v2050_v11 = vcombine.low %v670_v55, %v671_v8  ;;  %vm661_vm9 = vcmp.ne.s16.totalorder %v635_v15, 0  ;;  %v625_v41 = vsel %vm3094_vm11, %v620_v14, %v2873_v10  ;;  %vm1821_vm6 = vcmask 1043459  }
  0xb6   : > { %v674_v18 = vsel %vm661_vm9, %v2934_v49, 0  ;;  %vm660_vm13 = vcmp.ne.s16.totalorder %v625_v41, 0  ;;  %v640_v61 = vrot.slane %v639_v5, 4  ;;  %vm1824_vm7 = vcmask 1044484  }
  0xb7   : > { %v673_v28 = vsel %vm660_vm13, %v2931_v48, 0  ;;  %vm1827_vm10 = vcmask 1045509   ;;  %vm1830_vm12 = vcmask 1046534   ;;  %vm1833_vm4 = vcmask 1047559  }
  0xb8   : > { %v2051_v29 = vcombine.low %v672_v25, %v673_v28  ;;  %v645_v17 = vsel %vm3094_vm11, %v640_v61, %v2873_v10  ;;  %vm1115_vm11 = vsmask.f32 4352 }
  0xb9   : > { %vm662_vm14 = vcmp.ne.s16.totalorder %v645_v17, 0 }
  0xba   : > { %v675_v40 = vsel %vm662_vm14, %v2937_v50, 0 }
  0xbb   : > { %v2052_v22 = vcombine.low %v674_v18, %v675_v40  ;;  %v2409_v18 = vld [vmem:[#allocation5 + $0x80] sm:$0xff]  }
  0xf1   : > { %v979_v26 = vpop.permute.xlu0 %978 }
  0xf2   : > { %v1056_v49 = vsel %vm1053_vm0, %v3119_v3, %v979_v26 }
  0xf4   : > { %v983_v27 = vpop.permute.xlu1 %982 }
  0xf5   : > { %v981_v30 = vpop.permute.xlu0 %980  ;;  %v1062_v39 = vsel %vm1053_vm0, %v3143_v43, %v983_v27 }
  0xf6   : > { %v1059_v10 = vsel %vm1053_vm0, %v2048_v58, %v981_v30 }
  0xf8   : > { %v985_v33 = vpop.permute.xlu1 %984 }
  0xf9   : > { %v1065_v51 = vsel %vm1053_vm0, %v2050_v11, %v985_v33  ;;  %v2053_v11 = vcombine.low %v3154_v53, %v3154_v53 }
  0xfd   : > { %v1040_v34 = vpop.permute.xlu0 %1039 }
  0xfe   : > { %v1077_v48 = vsel %vm1075_vm15, %v1056_v49, %v1040_v34 }
  0xff   : > { %v1269_v23 = vshrl.u32 %v1077_v48, 16  ;;  %v1272_v35 = vshll.u32 %v1077_v48, 16  ;;  %v2410_v48 = vld [vmem:[#allocation5 + $0x88] sm:$0xff]  }
 0x101   : > { %v1271_v47 = vrot.slane %v1269_v23, 3  ;;  %v1274_v32 = vrot.slane %v1272_v35, 4 }
 0x102   : > { %v1042_v50 = vpop.permute.xlu1 %1041 }
 0x103   : > { %v1079_v36 = vsel %vm1075_vm15, %v1059_v10, %v1042_v50  ;;  %v1275_v46 = vor.u32 %v1274_v32, %v1271_v47 }
 0x104   : > { %v1116_v37 = vshrl.u32 %v1079_v36, 16  ;;  %v1119_v38 = vshll.u32 %v1079_v36, 16 }
 0x106   : > { %v1044_v3 = vpop.permute.xlu0 %1043  ;;  %v1118_v16 = vrot.slane %v1116_v37, 3  ;;  %v1121_v42 = vrot.slane %v1119_v38, 4 }
 0x107   : > { %v1081_v44 = vsel %vm1075_vm15, %v1062_v39, %v1044_v3  ;;  %v1046_v45 = vpop.permute.xlu1 %1045 }
 0x108   : > { %v1123_v52 = vshrl.u32 %v1081_v44, 16  ;;  %v1126_v24 = vshll.u32 %v1081_v44, 16  ;;  %v1083_v21 = vsel %vm1075_vm15, %v1065_v51, %v1046_v45  ;;  %v1122_v13 = vor.u32 %v1121_v42, %v1118_v16 }
 0x109   : > { %v1131_v19 = vshrl.u32 %v1083_v21, 16  ;;  %v1134_v12 = vshll.u32 %v1083_v21, 16 }
 0x10a   : > { %v1125_v62 = vrot.slane %v1123_v52, 3  ;;  %v1128_v43 = vrot.slane %v1126_v24, 4  ;;  %v1276_v57 = vsel %vm1115_vm11, %v1275_v46, %v1122_v13  ;;  %v987_v63 = vpop.permute.xlu0 %986 }
 0x10b   : > { %v1133_v31 = vrot.slane %v1131_v19, 3  ;;  %v1136_v54 = vrot.slane %v1134_v12, 4  ;;  %2235 = vmatprep.mubr.msk.bf16.mxu0 %vm1191_vm1, %v1276_v57  ;;  %v989_v6 = vpop.permute.xlu1 %988  ;;  %v1068_v0 = vsel %vm1053_vm0, %v2051_v29, %v987_v63  ;;  %v2626_v19 = vmov 1983009808  }
 0x10c   : > { %v1129_v58 = vor.u32 %v1128_v43, %v1125_v62  ;;  %v1071_v2 = vsel %vm1053_vm0, %v2052_v22, %v989_v6  ;;  %v1588_v12 = vunpack.c.l.s4 %v2626_v19 }
 0x10d   : > { %v1137_v59 = vor.u32 %v1136_v54, %v1133_v31  ;;  %v3226_v31 = vld [vmem:[#allocation7] ss:$0 sm:$0xff] }
 0x10e   : > { %v1130_v55 = vsel %vm1115_vm11, %v1122_v13, %v1129_v58  ;;  %v1589_v62 = vunpack.c.0.s8 %v1588_v12 }
 0x10f   : > { %2215 = vmatprep.mubr.msk.bf16.mxu1 %vm1191_vm1, %v1130_v55  ;;  %2236 = vmatmul.mubr.msk.bf16.vlgmr.msra.gmra.mrb[0].mxu0 %vm1191_vm1, %v1130_v55  ;;  %v1138_v4 = vsel %vm1115_vm11, %v1129_v58, %v1137_v59 }
 0x110   : > { %2244 = vmatpush3.bf16.msra.mxu0 %v3038_v56  ;;  %2216 = vmatmul.mubr.msk.bf16.vlgmr.msra.gmra.mrb[0].mxu1 %vm1191_vm1, %v1138_v4  ;;  %v3231_v6 = vsub.s32 %v1589_v62, %v2856_v1 }
 0x111   : > { %2239 = vmatprep.mubr.msk.bf16.mxu0 %vm1191_vm1, %v1138_v4  ;;  %2269 = vmatpush3.bf16.msra.mxu1 %v3038_v56 }
 0x112   : > { %2245 = vmatprep.subr.bf16.mxu0 %v2406_v60  ;;  %2264 = vmatprep.subr.bf16.mxu1 %v2406_v60 }
 0x114   : > { %2246 = vmatpush3.bf16.msra.mxu0 %v2406_v60 }
 0x115   : > { %2270 = vmatpush3.bf16.msra.mxu1 %v2406_v60  ;;  %2247 = vmatprep.subr.bf16.mxu0 %v2407_v20 }
 0x116   : > { %v1048_v8 = vpop.permute.xlu0 %1047  ;;  %2265 = vmatprep.subr.bf16.mxu1 %v2407_v20 }
 0x117   : > { %v1085_v25 = vsel %vm1075_vm15, %v1068_v0, %v1048_v8  ;;  %v1050_v9 = vpop.permute.xlu1 %1049 }
 0x118   : > { %v1139_v56 = vshrl.u32 %v1085_v25, 16  ;;  %v1142_v14 = vshll.u32 %v1085_v25, 16  ;;  %v1087_v15 = vsel %vm1075_vm15, %v1071_v2, %v1050_v9  ;;  %2248 = vmatpush3.bf16.msra.mxu0 %v2407_v20 }
 0x119   : > { %v1147_v5 = vshrl.u32 %v1087_v15, 16  ;;  %v1150_v41 = vshll.u32 %v1087_v15, 16  ;;  %2271 = vmatpush3.bf16.msra.mxu1 %v2407_v20  ;;  %2249 = vmatprep.subr.bf16.mxu0 %v2408_v7 }
 0x11a   : > { %v1141_v61 = vrot.slane %v1139_v56, 3  ;;  %v1144_v28 = vrot.slane %v1142_v14, 4  ;;  %v991_v29 = vpop.permute.xlu0 %990  ;;  %2266 = vmatprep.subr.bf16.mxu1 %v2408_v7 }
 0x11b   : > { %v1149_v17 = vrot.slane %v1147_v5, 3  ;;  %v1152_v40 = vrot.slane %v1150_v41, 4  ;;  %v1074_v22 = vsel %vm1053_vm0, %v2053_v11, %v991_v29  ;;  %v1052_v26 = vpop.permute.xlu1 %1051 }
 0x11c   : > { %v1145_v53 = vor.u32 %v1144_v28, %v1141_v61  ;;  %v1089_v27 = vsel %vm1075_vm15, %v1074_v22, %v1052_v26  ;;  %2250 = vmatpush3.bf16.msra.mxu0 %v2408_v7 }
 0x11d   : > { %v1153_v30 = vor.u32 %v1152_v40, %v1149_v17  ;;  %v1394_v33 = vshrl.u32 %v1089_v27, 16  ;;  %v1397_v49 = vshll.u32 %v1089_v27, 16  ;;  %2272 = vmatpush3.bf16.msra.mxu1 %v2408_v7  ;;  %2251 = vmatprep.subr.bf16.mxu0 %v2409_v18 }
 0x11e   : > { %v1146_v34 = vsel %vm1115_vm11, %v1137_v59, %v1145_v53  ;;  %2267 = vmatprep.subr.bf16.mxu1 %v2409_v18 }
 0x11f   : > { %v1396_v23 = vrot.slane %v1394_v33, 3  ;;  %v1399_v35 = vrot.slane %v1397_v49, 4  ;;  %2219 = vmatprep.mubr.msk.bf16.mxu1 %vm1191_vm1, %v1146_v34  ;;  %2240 = vmatmul.mubr.msk.bf16.gmra.mrb[4].mxu0 %vm1191_vm1, %v1146_v34  ;;  %v1154_v10 = vsel %vm1115_vm11, %v1145_v53, %v1153_v30 }
 0x120   : > { %2220 = vmatmul.mubr.msk.bf16.gmra.mrb[4].mxu1 %vm1191_vm1, %v1154_v10  ;;  %2255 = vmatprep.mubr.msk.bf16.mxu0 %vm1191_vm1, %v1138_v4 }
 0x121   : > { %v1400_v47 = vor.u32 %v1399_v35, %v1396_v23  ;;  %2259 = vmatprep.mubr.msk.bf16.mxu1 %vm1191_vm1, %v1154_v10  ;;  %2252 = vmatpush3.bf16.msra.mxu0 %v2409_v18 }
 0x122   : > { %2273 = vmatpush3.bf16.msra.mxu1 %v2409_v18  ;;  %2253 = vmatprep.subr.bf16.mxu0 %v2410_v48 }
 0x123   : > { %2268 = vmatprep.subr.bf16.mxu1 %v2410_v48  ;;  %v1401_v32 = vsel %vm1115_vm11, %v1153_v30, %v1400_v47 }
 0x125   : > { %2254 = vmatpush3.bf16.msra.mxu0 %v2410_v48 }
 0x126   : > { %2274 = vmatpush3.bf16.msra.mxu1 %v2410_v48 }
 0x128   : > { %2256 = vmatmul.mubr.msk.bf16.vlgmr.msra.gmra.mrb[0].mxu0 %vm1191_vm1, %v1146_v34 }
 0x129   : > { %2260 = vmatmul.mubr.msk.bf16.vlgmr.msra.gmra.mrb[8].mxu1 %vm1191_vm1, %v1401_v32 }
 0x1e3   : > { %v2217_v50 = vpop.f32.mrb[0].mxu1 }
 0x1e4   : > { %v1238_v36 = vpop.f32.mrb[1].mxu1 }
 0x1e5   : > { %v2218_v37 = vpop.f32.mrb[2].mxu1 }
 0x1e6   : > { %v1241_v38 = vpop.f32.mrb[3].mxu1 }
 0x1f2   : > { %v2241_v39 = vpop.f32.mrb[4].mxu0 }
 0x1f3   : > { %v2221_v51 = vpop.f32.mrb[4].mxu1  ;;  %v1366_v3 = vpop.f32.mrb[5].mxu0 }
 0x1f4   : > { %v1375_v16 = vadd.f32 %v2241_v39, %v2221_v51  ;;  %v1254_v42 = vpop.f32.mrb[5].mxu1  ;;  %v2242_v44 = vpop.f32.mrb[6].mxu0 }
 0x1f5   : > { %v1367_v45 = vadd.f32 %v1366_v3, %v1254_v42  ;;  %v2222_v46 = vpop.f32.mrb[6].mxu1  ;;  %v1369_v52 = vpop.f32.mrb[7].mxu0 }
 0x1f6   : > { %v1378_v24 = vadd.f32 %v2242_v44, %v2222_v46  ;;  %v1257_v21 = vpop.f32.mrb[7].mxu1 }
 0x1f7   : > { %v1370_v13 = vadd.f32 %v1369_v52, %v1257_v21 }
 0x1fb   : > { %v2257_v43 = vpop.f32.mrb[0].mxu0 }
 0x1fc   : > { %v2275_v54 = vadd.f32 %v2257_v43, %v2217_v50  ;;  %v1475_v57 = vpop.f32.mrb[1].mxu0  ;;  %v2261_v58 = vpop.f32.mrb[8].mxu1 }
 0x1fd   : > { %v2276_v59 = vadd.f32 %v1475_v57, %v1238_v36  ;;  %v1512_v55 = vadd.f32 %v2261_v58, %v1375_v16  ;;  %v2258_v60 = vpop.f32.mrb[2].mxu0  ;;  %v1491_v4 = vpop.f32.mrb[9].mxu1 }
 0x1fe   : > { %v1523_v63 = vadd.f32 %v2275_v54, %v3226_v31  ;;  %v2277_v20 = vadd.f32 %v2258_v60, %v2218_v37  ;;  %v1510_v0 = vadd.f32 %v1491_v4, %v1367_v45  ;;  %v1478_v2 = vpop.f32.mrb[3].mxu0  ;;  %v2262_v7 = vpop.f32.mrb[10].mxu1 }
 0x1ff   : > { %v1521_v8 = vadd.f32 %v2276_v59, %v3226_v31  ;;  %v1527_v25 = vadd.f32 %v3226_v31, %v1512_v55  ;;  %v2278_v9 = vadd.f32 %v1478_v2, %v1241_v38  ;;  %v1513_v11 = vadd.f32 %v2262_v7, %v1378_v24  ;;  %v1494_v56 = vpop.f32.mrb[11].mxu1 }
 0x200   : > { %v1531_v14 = vmax.f32 %v1523_v63, 0.0  ;;  %v1524_v15 = vadd.f32 %v2277_v20, %v3226_v31  ;;  %v1525_v5 = vadd.f32 %v3226_v31, %v1510_v0  ;;  %v1511_v41 = vadd.f32 %v1494_v56, %v1370_v13 }
 0x201   : > { %v1529_v18 = vmax.f32 %v1521_v8, 0.0  ;;  %v1535_v1 = vmax.f32 %v1527_v25, 0.0  ;;  %v1522_v61 = vadd.f32 %v2278_v9, %v3226_v31  ;;  %v1528_v28 = vadd.f32 %v3226_v31, %v1513_v11 }
 0x202   : > { %v2149_v29 = vpack.c.bf16 %v1531_v14, %v1531_v14  ;;  %v1532_v17 = vmax.f32 %v1524_v15, 0.0  ;;  %v1533_v40 = vmax.f32 %v1525_v5, 0.0  ;;  %v1526_v20 = vadd.f32 %v3226_v31, %v1511_v41 }
 0x203   : > { %v2147_v22 = vpack.c.bf16 %v1529_v18, %v1529_v18  ;;  %v1578_v26 = vmax.f32 %v1529_v18, %v1531_v14  ;;  %v2153_v53 = vpack.c.bf16 %v1535_v1, %v1535_v1  ;;  %v1530_v27 = vmax.f32 %v1522_v61, 0.0 }
 0x204   : > { %1572 = vst.msk [vmem:[%s3239_s21 + $0x8] sm:$0xf] %vm1569_vm2, %v2149_v29  ;;  %v2150_v30 = vpack.c.bf16 %v1532_v17, %v1532_v17  ;;  %v2151_v33 = vpack.c.bf16 %v1533_v40, %v1533_v40  ;;  %v1580_v49 = vmax.f32 %v1533_v40, %v1535_v1  ;;  %v3243_v34 = vmax.f32 %v1528_v28, 0.0 }
 0x205   : > { %1570 = vst.msk [vmem:[%s3239_s21] sm:$0xf] %vm1569_vm2, %v2147_v22  ;;  %v1586_v48 = vcombine.high %v1578_v26, %v1578_v26  ;;  %v1593_v23 = vrot.slane %v1578_v26, %v3231_v6  ;;  %1576 = vst.msk [vmem:[%s3239_s21 + $0x18] sm:$0xf] %vm1569_vm2, %v2153_v53  ;;  %v2148_v35 = vpack.c.bf16 %v1530_v27, %v1530_v27  ;;  %v1534_v28 = vmax.f32 %v1526_v20, 0.0 }
 0x206   : > { %v1579_v10 = vmax.f32 %v1530_v27, %v1532_v17  ;;  %1573 = vst.msk [vmem:[%s3239_s21 + $0xc] sm:$0xf] %vm1569_vm2, %v2150_v30  ;;  %1574 = vst.msk [vmem:[%s3239_s21 + $0x10] sm:$0xf] %vm1569_vm2, %v2151_v33  ;;  %v1620_v47 = vcombine.high %v1580_v49, %v1580_v49  ;;  %v1627_v32 = vrot.slane %v1580_v49, %v3231_v6 }
 0x207   : > { %v2154_v50 = vpack.c.bf16 %v3243_v34, %v3243_v34  ;;  %v1600_v36 = vrot.slane %v1586_v48, %v3231_v6  ;;  %v1601_v37 = vcombine.high %v1593_v23, %v1593_v23  ;;  %v2106_v38 = vrot.slane %v1593_v23, 9  ;;  %1571 = vst.msk [vmem:[%s3239_s21 + $0x4] sm:$0xf] %vm1569_vm2, %v2148_v35 }
 0x208   : > { %v1634_v39 = vrot.slane %v1620_v47, %v3231_v6  ;;  %v1635_v51 = vcombine.high %v1627_v32, %v1627_v32  ;;  %v1603_v24 = vcombine.high %v1579_v10, %v1579_v10  ;;  %v2114_v13 = vrot.slane %v1627_v32, 9 }
 0x209   : > { %1577 = vst.msk [vmem:[%s3239_s21 + $0x1c] sm:$0xf] %vm1569_vm2, %v2154_v50  ;;  %v1602_v3 = vcombine.high %v1600_v36, %v1600_v36  ;;  %v2107_v16 = vrot.slane %v1601_v37, 9  ;;  %v2108_v42 = vrot.slane %v1600_v36, 9  ;;  %v1718_v44 = vmax.f32 %v1593_v23, %v2106_v38 }
 0x20a   : > { %v1636_v45 = vcombine.high %v1634_v39, %v1634_v39  ;;  %v2115_v46 = vrot.slane %v1635_v51, 9  ;;  %v2116_v52 = vrot.slane %v1634_v39, 9  ;;  %v1610_v57 = vrot.slane %v1579_v10, %v3231_v6 }
 0x20b   : > { %v2109_v21 = vrot.slane %v1602_v3, 9  ;;  %v1719_v19 = vmax.f32 %v1601_v37, %v2107_v16  ;;  %v1720_v12 = vmax.f32 %v1600_v36, %v2108_v42  ;;  %v2155_v59 = vpack.c.bf16 %v1718_v44, %v1718_v44 }
 0x20c   : > { %v2117_v62 = vrot.slane %v1636_v45, 9  ;;  %v1727_v43 = vmax.f32 %v1635_v51, %v2115_v46  ;;  %v1728_v54 = vmax.f32 %v1634_v39, %v2116_v52  ;;  %v1617_v8 = vrot.slane %v1603_v24, %v3231_v6 }
 0x20d   : > { %v1721_v58 = vmax.f32 %v1602_v3, %v2109_v21  ;;  %v2156_v55 = vpack.c.bf16 %v1719_v19, %v1719_v19  ;;  %v2157_v60 = vpack.c.bf16 %v1720_v12, %v1720_v12  ;;  %v1726_v25 = vmax.f32 %v1627_v32, %v2114_v13 }
 0x20e   : > { %v1729_v4 = vmax.f32 %v1636_v45, %v2117_v62  ;;  %v2164_v63 = vpack.c.bf16 %v1727_v43, %v1727_v43  ;;  %v2165_v9 = vpack.c.bf16 %v1728_v54, %v1728_v54  ;;  %v1618_v56 = vcombine.high %v1610_v57, %v1610_v57 }
 0x20f   : > { %v2158_v0 = vpack.c.bf16 %v1721_v58, %v1721_v58  ;;  %v1799_v2 = vunpack.c.l.b16 %v2156_v55  ;;  %v1800_v7 = vunpack.c.l.b16 %v2157_v60  ;;  %v1798_v14 = vunpack.c.l.b16 %v2155_v59 }
 0x210   : > { %v2166_v11 = vpack.c.bf16 %v1729_v4, %v1729_v4  ;;  %v1619_v18 = vcombine.high %v1617_v8, %v1617_v8  ;;  %v2110_v61 = vrot.slane %v1610_v57, 9  ;;  %v3268_v41 = vunpack.c.l.b16 %v2164_v63 }
 0x211   : > { %v1801_v15 = vunpack.c.l.b16 %v2158_v0  ;;  %v1814_v5 = vrot.slane %v1799_v2, 7  ;;  %v1817_v1 = vrot.slane %v1800_v7, 6  ;;  %v2111_v29 = vrot.slane %v1618_v56, 9 }
 0x212   : > { %v2112_v17 = vrot.slane %v1617_v8, 9  ;;  %v2163_v40 = vpack.c.bf16 %v1726_v25, %v1726_v25  ;;  %v3271_v22 = vunpack.c.l.b16 %v2165_v9  ;;  %v3273_v26 = vunpack.c.l.b16 %v2166_v11 }
 0x213   : > { %v1816_v31 = vsel %vm1815_vm3, %v1814_v5, %v1798_v14  ;;  %v2113_v53 = vrot.slane %v1619_v18, 9  ;;  %v1820_v27 = vrot.slane %v1801_v15, 5  ;;  %v1722_v30 = vmax.f32 %v1610_v57, %v2110_v61 }
 0x214   : > { %v1723_v33 = vmax.f32 %v1618_v56, %v2111_v29  ;;  %v1724_v49 = vmax.f32 %v1617_v8, %v2112_v17  ;;  %v1819_v48 = vsel %vm1818_vm5, %v1817_v1, %v1816_v31  ;;  %v2152_v35 = vpack.c.bf16 %v1534_v28, %v1534_v28 }
 0x215   : > { %v1725_v23 = vmax.f32 %v1619_v18, %v2113_v53  ;;  %v1581_v10 = vmax.f32 %v1534_v28, %v3243_v34  ;;  %v1835_v47 = vrot.slane %v3268_v41, 7  ;;  %v2159_v32 = vpack.c.bf16 %v1722_v30, %v1722_v30 }
 0x216   : > { %v2160_v50 = vpack.c.bf16 %v1723_v33, %v1723_v33  ;;  %v2161_v36 = vpack.c.bf16 %v1724_v49, %v1724_v49  ;;  %v1806_v37 = vunpack.c.l.b16 %v2163_v40  ;;  %1575 = vst.msk [vmem:[%s3239_s21 + $0x14] sm:$0xf] %vm1569_vm2, %v2152_v35  ;;  %v1822_v42 = vsel %vm1821_vm6, %v1820_v27, %v1819_v48 }
 0x217   : > { %v2162_v38 = vpack.c.bf16 %v1725_v23, %v1725_v23  ;;  %v1637_v39 = vcombine.high %v1581_v10, %v1581_v10  ;;  %v1644_v51 = vrot.slane %v1581_v10, %v3231_v6  ;;  %v1802_v3 = vunpack.c.l.b16 %v2159_v32 }
 0x218   : > { %v1803_v34 = vunpack.c.l.b16 %v2160_v50  ;;  %v1804_v16 = vunpack.c.l.b16 %v2161_v36 }
 0x219   : > { %2510 = shalt.err (!%p2507_p5)
}
 0x21a   : > { %s2511_s10 = scalar_lea.hbm %s3278_s8, 512  ;;  %s2515_s21 = scalar_lea.hbm %s3393_s3, 4096 }
 0x21b   : > { %p2512_p9 = scmp.ne.s32.totalorder %s3278_s8, %s2511_s10  ;;  %p2516_p3 = scmp.lt.u32.totalorder %s3278_s8, %s3393_s3 }
 0x21c   : > { %p2517_p7 = scmp.lt.u32.totalorder %s2515_s21, %s2511_s10  ;;  %p2519_p2 = scmp.lt.u32.totalorder %s2511_s10, %s3278_s8 }
 0x21d   : > { %p2513_p12 = pnand %p2512_p9, %p2784_p11 }
 0x21e   : > { %p2518_p10 = por %p2517_p7, %p2516_p3 }
 0x21f   : > { %p2514_p1 = pneg %p2513_p12 }
 0x220   : > { %p2520_p4 = por %p2519_p2, %p2518_p10 }
 0x222   : > { %p2521_p6 = pnand %p2520_p4, %p2514_p1 }
 0x224   : > { %2524 = shalt.err (!%p2521_p6)
}
 0x225   : > { %s2628_s5 = smov 4   ;;  %v1805_v44 = vunpack.c.l.b16 %v2162_v38  ;;  %v1651_v45 = vrot.slane %v1637_v39, %v3231_v6  ;;  %v1652_v46 = vcombine.high %v1644_v51, %v1644_v51  ;;  %v2118_v52 = vrot.slane %v1644_v51, 9  ;;  %s1861_s10 = scalar_lea.sflag [#allocation10], %s2842_s9 }
 0x226   : > { %2301 = dma.vmem_to_hbm [thread:$0]  (%p2784_p11), %s3282_s14, 512, %s3278_s8, %s1856_s6, %s2625_s25, %s2625_s25, %s2628_s5   ;;  %v1836_v24 = vsel %vm1815_vm3, %v1835_v47, %v1806_v37  ;;  %v1837_v21 = vrot.slane %v3271_v22, 6  ;;  %v1839_v19 = vrot.slane %v3273_v26, 5  ;;  %v1823_v12 = vrot.slane %v1802_v3, 4 }
 0x227   : > { %v1826_v13 = vrot.slane %v1803_v34, 3  ;;  %v1653_v62 = vcombine.high %v1651_v45, %v1651_v45  ;;  %v2119_v43 = vrot.slane %v1652_v46, 9  ;;  %v2120_v54 = vrot.slane %v1651_v45, 9  ;;  %s2046_s14 = sshll.u32 %s2842_s9, 3  ;;  %s2172_s6 = sshll.u32 %s2607_s18, 7 }
 0x228   : > { %v1825_v57 = vsel %vm1824_vm7, %v1823_v12, %v1822_v42  ;;  %v1829_v58 = vrot.slane %v1804_v16, 2  ;;  %v1832_v59 = vrot.slane %v1805_v44, 1  ;;  %v1730_v55 = vmax.f32 %v1644_v51, %v2118_v52  ;;  %s283_s8 = scalar_lea.vmem [#allocation9], %s2046_s14  ;;  %s3336_s24 = scalar_lea.hbm %s3394_s4, %s2172_s6 }
 0x229   : > { %v1828_v6 = vsel %vm1827_vm10, %v1826_v13, %v1825_v57  ;;  %v2121_v60 = vrot.slane %v1653_v62, 9  ;;  %v1731_v4 = vmax.f32 %v1652_v46, %v2119_v43  ;;  %v1732_v63 = vmax.f32 %v1651_v45, %v2120_v54  ;;  %s1892_s11 = sshll.u32 %s283_s8, 4  ;;  %s2629_s23 = smov [#allocation9]   ;;  %s3338_s11 = int_to_ptr.vmem [resolvable:$true] %s1892_s11 }
 0x22a   : > { %v1838_v20 = vsel %vm1818_vm5, %v1837_v21, %v1836_v24  ;;  %v1831_v0 = vsel %vm1830_vm12, %v1829_v58, %v1828_v6  ;;  %v2167_v2 = vpack.c.bf16 %v1730_v55, %v1730_v55  ;;  %s2525_s18 = scalar_lea.vmem %s3338_s11, 128  ;;  %s2529_s27 = sshll.u32 %s2629_s23, 4  ;;  %s2530_s27 = int_to_ptr.vmem [resolvable:$false] %s2529_s27 }
 0x22b   : > { %v1834_v7 = vsel %vm1833_vm4, %v1832_v59, %v1831_v0  ;;  %v1733_v8 = vmax.f32 %v1653_v62, %v2121_v60  ;;  %v2168_v25 = vpack.c.bf16 %v1731_v4, %v1731_v4  ;;  %v2169_v9 = vpack.c.bf16 %v1732_v63, %v1732_v63  ;;  %p2526_p8 = scmp.ne.s32.totalorder %s3338_s11, %s2525_s18  ;;  %s2531_s21 = scalar_lea.vmem %s2530_s27, 256 }
 0x22c   : > { %v1849_v11 = vpack.c.b16 %v1834_v7, %v1834_v7  ;;  %v1810_v56 = vunpack.c.l.b16 %v2167_v2  ;;  %v1840_v18 = vsel %vm1821_vm6, %v1839_v19, %v1838_v20  ;;  %p2532_p5 = scmp.lt.s32.totalorder %s3338_s11, %s2530_s27  ;;  %p2533_p9 = scmp.lt.s32.totalorder %s2531_s21, %s2525_s18 }
 0x22d   : > { %v2170_v14 = vpack.c.bf16 %v1733_v8, %v1733_v8  ;;  %v1811_v15 = vunpack.c.l.b16 %v2168_v25  ;;  %v1812_v5 = vunpack.c.l.b16 %v2169_v9  ;;  %p2527_p13 = pnand %p2526_p8, %p2784_p11 }
 0x22e   : > { %v1841_v1 = vrot.slane %v1810_v56, 4  ;;  %1853 = vst.msk [vmem:[%s283_s8] sm:$0xf] %vm1569_vm2, %v1849_v11  ;;  %p2534_p12 = por %p2533_p9, %p2532_p5 }
 0x22f   : > { %v1813_v61 = vunpack.c.l.b16 %v2170_v14  ;;  %v1843_v28 = vrot.slane %v1811_v15, 3  ;;  %v1845_v41 = vrot.slane %v1812_v5, 2  ;;  %p2528_p0 = pneg %p2527_p13 }
 0x230   : > { %v1842_v31 = vsel %vm1824_vm7, %v1841_v1, %v1840_v18 }
 0x231   : > { %v1844_v29 = vsel %vm1827_vm10, %v1843_v28, %v1842_v31  ;;  %v1847_v17 = vrot.slane %v1813_v61, 1  ;;  %p2535_p1 = pnand %p2534_p12, %p2528_p0 }
 0x232   : > { %v1846_v40 = vsel %vm1830_vm12, %v1845_v41, %v1844_v29 }
 0x233   : > { %v1848_v22 = vsel %vm1833_vm4, %v1847_v17, %v1846_v40 }
 0x234   : > { %v1850_v26 = vpack.c.b16 %v1848_v22, %v1848_v22 }
 0x236   : > { %1854 = vst.msk [vmem:[%s283_s8 + $0x4] sm:$0xf] %vm1569_vm2, %v1850_v26 }
 0x237   : > { %2538 = shalt.err (!%p2535_p1)
}
 0x238   : > { %s2539_s22 = scalar_lea.hbm %s3336_s24, 128  ;;  %s2543_s8 = scalar_lea.hbm %s3394_s4, 1024 }
 0x239   : > { %p2540_p3 = scmp.ne.s32.totalorder %s3336_s24, %s2539_s22  ;;  %p2544_p2 = scmp.lt.u32.totalorder %s3336_s24, %s3394_s4 }
 0x23a   : > { %p2545_p4 = scmp.lt.u32.totalorder %s2543_s8, %s2539_s22  ;;  %p2547_p8 = scmp.lt.u32.totalorder %s2539_s22, %s3336_s24 }
 0x23b   : > { %p2541_p7 = pnand %p2540_p3, %p2784_p11 }
 0x23c   : > { %p2546_p6 = por %p2545_p4, %p2544_p2 }
 0x23d   : > { %p2542_p10 = pneg %p2541_p7 }
 0x23e   : > { %p2548_p13 = por %p2547_p8, %p2546_p6 }
 0x240   : > { %p2549_p0 = pnand %p2548_p13, %p2542_p10 }
 0x242   : > { %2552 = shalt.err (!%p2549_p0)
}
 0x243   : > { %2302 = dma.vmem_to_hbm [thread:$0]  (%p2784_p11), %s3338_s11, 128, %s3336_s24, %s1861_s10, %s2625_s25, %s2625_s25, %s2628_s5  }
 0x244 PF: > { %p2328_p5 = scmp.ge.s32.totalorder %s2615_s20, 2  ;;  %s1907_s13 = sand.u32 1, %s2595_s15  }
 0x245   : > { %p3431_p9 = scmp.ne.s32.totalorder %s3402_s26, 0  ;;  %s1908_s18 = scalar_lea.sflag [#allocation4], %s1907_s13 }
 0x247   : > { %p2317_p12 = pnand %p2328_p5, %p3431_p9 }
 0x249   : > { %2586 = dma.done.wait (!%p2317_p12), %s1908_s18, 512  }
 0x24a   : > { %2588 = vsyncadd (!%p2317_p12), %s1908_s18, 4294966784  ;;  %s1917_s30 = scalar_lea.sflag [#allocation10], %s1907_s13 }
 0x24b   : > { %2590 = dma.done.wait (!%p2317_p12), %s1917_s30, 128  }
 0x24c   : > { %2592 = vsyncadd (!%p2317_p12), %s1917_s30, 4294967168  ;;  %s25_s20 = sadd.s32 1, %s2615_s20   ;;  %s3432_s15 = smov %s2599_s16 }
 0x24d   : > { %p22_p1 = scmp.ge.s32.totalorder %s25_s20, 10   ;;  %s3433_s16 = smov %s2603_s17 }
 0x24e   : > { %s3434_s17 = smov %s2793_s12  ;;  %s3435_s18 = smov %s2611_s19 }
 0x24f   : > { %s3436_s19 = smov %s3438_s7  ;;  %24 = sbr.rel (!%p22_p1) target bundleno = 9 (0x9), region = 106 }
 0x256   :  { %1922 = vsyncpa [#allocation3], 1 }
 0x257   :  { %1924 = vsyncpa [#allocation3 + $0x1], 1 }
 0x258   :  { %1925 = vsyncpa [#allocation6], 1 }
 0x259   :  { %1926 = vsyncpa [#allocation4], 1 }
 0x25a   :  { %1928 = vsyncpa [#allocation4 + $0x1], 1 }
 0x25b   :  { %1929 = vsyncpa [#allocation10], 1 }
 0x25c   :  { %1931 = vsyncpa [#allocation10 + $0x1], 1 }

</bundles_post_ra>
